<compile_context>
chip_gen: v5e
topology: v5e:2x2
jax: 0.10.0
libtpu: 0.0.40
codegen_flags: <defaults>
</compile_context>

<pallas_src>
import jax
import jax.numpy as jnp
from jax.experimental import pallas as pl
from jax.experimental.pallas import tpu as pltpu

BN_EPS = 1e-5
MXU_DTYPE = jnp.bfloat16     # HBM / MXU operand dtype
HIDDEN_DTYPE = jnp.bfloat16  # VMEM scratch dtype for the expanded activation


def _round_up(x, m):
    return (x + m - 1) // m * m


# ------------------------------- Pallas kernel ------------------------------ #

def _make_kernel(*, H, W, hidden, d, guard, has_expand, has_sub, use_res):
    HW = H * W
    # flat-index offset of depthwise tap (kh, kw) in the UNPADDED image
    offs = [((kh - 1) * W + (kw - 1)) * d for kh in range(3) for kw in range(3)]

    def kernel(*refs):
        it = iter(refs)
        x_ref = next(it)
        if has_expand:
            w_exp_ref = next(it)
            b_exp_ref = next(it)
        w_dw_ref = next(it)
        mask_ref = next(it)
        b_dw_ref = next(it)
        w_proj_ref = next(it)
        b_proj_ref = next(it)
        s_ref = next(it) if has_sub else None
        o_ref = next(it)
        h_scr = next(it)

        xv = x_ref[0]                                    # (cin, HW) bf16

        # ---- expand 1x1 (MXU, bf16 x bf16 -> f32 acc) + folded BN bias + ReLU6 --- #
        if has_expand:
            h = jnp.dot(w_exp_ref[...], xv, preferred_element_type=jnp.float32)
            h = jnp.clip(h + b_exp_ref[...], 0.0, 6.0)
            h = h.astype(h_scr.dtype)
        else:
            h = xv.astype(h_scr.dtype)                   # hidden == cin, no expand conv

        # Hidden activation lives only in VMEM: flat (hidden, HW) with zeroed flat
        # guards so the 9 shifted tap views never read uninitialized memory.  The
        # interior store is lane-aligned (guard is a multiple of 128).
        h_scr[:, 0:guard] = jnp.zeros((hidden, guard), h_scr.dtype)
        h_scr[:, guard + HW:2 * guard + HW] = jnp.zeros((hidden, guard), h_scr.dtype)
        h_scr[:, guard:guard + HW] = h

        # ---- depthwise 3x3 (VPU, f32 accumulation) + folded BN bias + ReLU6 ------ #
        # Each tap = lane-shifted flat view * border mask (per position, realizes the
        # conv zero padding) * tap weight (per channel, (hidden,1) lane-broadcast).
        wdw = w_dw_ref[...]                              # (hidden, 9) f32
        mks = mask_ref[...]                              # (9, 1, HW)  f32
        y = jnp.zeros((hidden, HW), jnp.float32)
        for k, off in enumerate(offs):
            tap = h_scr[:, guard + off:guard + off + HW].astype(jnp.float32)
            if off != 0:                                 # center tap is never masked
                tap = tap * mks[k]
            y = y + tap * wdw[:, k:k + 1]
        y = jnp.clip(y + b_dw_ref[...], 0.0, 6.0)
        yb = y.astype(MXU_DTYPE)

        # stride-2: subsample the stride-1 depthwise output with a 0/1 selection
        # matmul (exact on bf16 values; avoids lane-strided slices).
        if has_sub:
            yb = jnp.dot(yb, s_ref[...],
                         preferred_element_type=jnp.float32).astype(MXU_DTYPE)

        # ---- project 1x1 (MXU) + folded BN bias (+ residual) --------------------- #
        out = jnp.dot(w_proj_ref[...], yb, preferred_element_type=jnp.float32)
        out = out + b_proj_ref[...]
        if use_res:
            out = out + xv.astype(jnp.float32)
        o_ref[0] = out.astype(o_ref.dtype)

    return kernel


def _fused_call(x_flat, kp, *, B, cin, H, W, Ho, Wo, hidden, oup, d,
                has_expand, use_res, stride):
    HW = H * W
    No = Ho * Wo
    guard = _round_up(d * (W + 1), 128)                  # flat halo for the 9 tap shifts
    has_sub = stride == 2

    kernel = _make_kernel(H=H, W=W, hidden=hidden, d=d, guard=guard,
                          has_expand=has_expand, has_sub=has_sub, use_res=use_res)

    in_specs = [pl.BlockSpec((1, cin, HW), lambda b: (b, 0, 0))]
    args = [x_flat]
    if has_expand:
        in_specs += [pl.BlockSpec((hidden, cin), lambda b: (0, 0)),
                     pl.BlockSpec((hidden, 1), lambda b: (0, 0))]
        args += [kp["w_exp_t"], kp["b_exp"]]
    in_specs += [pl.BlockSpec((hidden, 9), lambda b: (0, 0)),
                 pl.BlockSpec((9, 1, HW), lambda b: (0, 0, 0)),
                 pl.BlockSpec((hidden, 1), lambda b: (0, 0)),
                 pl.BlockSpec((oup, hidden), lambda b: (0, 0)),
                 pl.BlockSpec((oup, 1), lambda b: (0, 0))]
    args += [kp["w_dw_t"], kp["mask"], kp["b_dw"], kp["w_proj_t"], kp["b_proj"]]
    if has_sub:
        in_specs += [pl.BlockSpec((HW, No), lambda b: (0, 0))]
        args += [kp["s_sub"]]

    flops = 2 * B * (9 * HW * hidden + No * hidden * oup
                     + (HW * cin * hidden if has_expand else 0)
                     + (HW * No * hidden if has_sub else 0))
    bytes_accessed = (sum(int(a.size) * a.dtype.itemsize for a in args)
                      + B * oup * No * 4)
    cost = pl.CostEstimate(flops=flops, transcendentals=0,
                           bytes_accessed=bytes_accessed)

    return pl.pallas_call(
        kernel,
        out_shape=jax.ShapeDtypeStruct((B, oup, No), jnp.float32),
        grid=(B,),
        in_specs=in_specs,
        out_specs=pl.BlockSpec((1, oup, No), lambda b: (b, 0, 0)),
        scratch_shapes=[pltpu.VMEM((hidden, 2 * guard + HW), HIDDEN_DTYPE)],
        compiler_params=pltpu.CompilerParams(
            dimension_semantics=("parallel",),
            vmem_limit_bytes=32 * 1024 * 1024),
        cost_estimate=cost,
    )(*args)


# --------------------------- parameters / wrappers -------------------------- #

def _bn_fold(kg, kb, km, kv, c):
    gamma = jax.random.normal(kg, (c,), dtype=jnp.float32) * 0.1 + 1.0
    beta = jax.random.normal(kb, (c,), dtype=jnp.float32) * 0.1
    mean = jax.random.normal(km, (c,), dtype=jnp.float32) * 0.1
    var = jax.random.uniform(kv, (c,), dtype=jnp.float32, minval=0.5, maxval=1.5)
    scale = gamma / jnp.sqrt(var + BN_EPS)
    bias = beta - mean * scale
    return scale, bias


def init_params(key, inp, oup, expand_ratio):
    hidden = int(round(inp * expand_ratio))
    keys = jax.random.split(key, 15)
    p = {}
    if expand_ratio != 1:
        # PyTorch weight (hidden, inp, 1, 1) -> (inp, hidden)
        p["w_exp"] = jax.random.normal(keys[0], (inp, hidden), jnp.float32) * 0.3
        p["s_exp"], p["b_exp"] = _bn_fold(keys[1], keys[2], keys[3], keys[4], hidden)
    # PyTorch depthwise weight (hidden, 1, 3, 3) -> (3, 3, hidden)
    p["w_dw"] = jax.random.normal(keys[5], (3, 3, hidden), jnp.float32) * 0.3
    p["s_dw"], p["b_dw"] = _bn_fold(keys[6], keys[7], keys[8], keys[9], hidden)
    # PyTorch weight (oup, hidden, 1, 1) -> (hidden, oup)
    p["w_proj"] = jax.random.normal(keys[10], (hidden, oup), jnp.float32) * 0.3
    p["s_proj"], p["b_proj"] = _bn_fold(keys[11], keys[12], keys[13], keys[14], oup)
    return p


def fold_params(params, *, has_expand):
    """Fold eval-mode BatchNorm scale into conv weights (canonical f32 layouts)."""
    fp = {}
    if has_expand:
        fp["w_exp"] = params["w_exp"] * params["s_exp"][None, :]
        fp["b_exp"] = params["b_exp"]
    fp["w_dw"] = params["w_dw"] * params["s_dw"][None, None, :]
    fp["b_dw"] = params["b_dw"]
    fp["w_proj"] = params["w_proj"] * params["s_proj"][None, :]
    fp["b_proj"] = params["b_proj"]
    return fp


def pack_kernel_params(fp, *, H, W, stride, dilation, has_expand):
    """Kernel operand layouts: channel-major weights, per-tap border masks, etc."""
    hidden = fp["w_dw"].shape[-1]
    d = dilation
    kp = {}
    if has_expand:
        kp["w_exp_t"] = fp["w_exp"].T.astype(MXU_DTYPE)                 # (hidden, cin)
        kp["b_exp"] = fp["b_exp"].reshape(hidden, 1).astype(jnp.float32)
    kp["w_dw_t"] = fp["w_dw"].reshape(9, hidden).T.astype(jnp.float32)  # (hidden, 9)
    kp["b_dw"] = fp["b_dw"].reshape(hidden, 1).astype(jnp.float32)
    kp["w_proj_t"] = fp["w_proj"].T.astype(MXU_DTYPE)                   # (oup, hidden)
    kp["b_proj"] = fp["b_proj"].reshape(-1, 1).astype(jnp.float32)

    # per-tap border masks over the flat spatial index (conv zero padding)
    r = jnp.arange(H)[:, None]
    w = jnp.arange(W)[None, :]
    masks = []
    for kh in range(3):
        for kw in range(3):
            rr = r + (kh - 1) * d
            ww = w + (kw - 1) * d
            masks.append(((rr >= 0) & (rr < H) & (ww >= 0) & (ww < W)).reshape(-1))
    kp["mask"] = jnp.stack(masks).astype(jnp.float32).reshape(9, 1, H * W)

    if stride == 2:
        Ho = (H - 1) // 2 + 1
        Wo = (W - 1) // 2 + 1
        src = (jnp.arange(Ho) * 2)[:, None] * W + (jnp.arange(Wo) * 2)[None, :]
        kp["s_sub"] = (jnp.arange(H * W)[:, None] == src.reshape(1, -1)
                       ).astype(MXU_DTYPE)                              # (HW, Ho*Wo)
    return kp


def inverted_residual_forward(x_nchw, kp, *, inp, oup, stride, expand_ratio,
                              dilation=1):
    assert stride in (1, 2)
    has_expand = expand_ratio != 1
    use_res = (stride == 1) and (inp == oup)
    B, cin, H, W = x_nchw.shape
    hidden = int(round(inp * expand_ratio))
    Ho = (H - 1) // stride + 1
    Wo = (W - 1) // stride + 1
    x_flat = x_nchw.reshape(B, cin, H * W).astype(MXU_DTYPE)   # NCHW is already channel-major
    out = _fused_call(x_flat, kp, B=B, cin=cin, H=H, W=W, Ho=Ho, Wo=Wo,
                      hidden=hidden, oup=oup, d=dilation,
                      has_expand=has_expand, use_res=use_res, stride=stride)
    return out.reshape(B, oup, Ho, Wo)


# ------------------------------ pure-JAX reference -------------------------- #

def reference_forward(x_nchw, fp, *, inp, oup, stride, expand_ratio, dilation=1):
    has_expand = expand_ratio != 1
    use_res = (stride == 1) and (inp == oup)
    d = dilation
    # mirror the kernel's bf16 casts so the comparison isolates real bugs
    x = jnp.transpose(x_nchw, (0, 2, 3, 1)).astype(MXU_DTYPE).astype(jnp.float32)
    if has_expand:
        w = fp["w_exp"].astype(MXU_DTYPE).astype(jnp.float32)
        h = jnp.einsum("bhwc,cd->bhwd", x, w)
        h = jnp.clip(h + fp["b_exp"], 0.0, 6.0)
    else:
        h = x
    h = h.astype(HIDDEN_DTYPE).astype(jnp.float32)
    C = h.shape[-1]
    h = jax.lax.conv_general_dilated(
        h, fp["w_dw"].reshape(3, 3, 1, C),
        window_strides=(stride, stride),
        padding=((d, d), (d, d)),
        rhs_dilation=(d, d),
        dimension_numbers=("NHWC", "HWIO", "NHWC"),
        feature_group_count=C)
    h = jnp.clip(h + fp["b_dw"], 0.0, 6.0)
    h = h.astype(MXU_DTYPE).astype(jnp.float32)
    wp = fp["w_proj"].astype(MXU_DTYPE).astype(jnp.float32)
    out = jnp.einsum("bhwc,cd->bhwd", h, wp) + fp["b_proj"]
    if use_res:
        out = out + x
    return jnp.transpose(out, (0, 3, 1, 2))


# ----------------------------------- main ----------------------------------- #

if __name__ == "__main__":
    key = jax.random.PRNGKey(0)
    B, H, W = 2, 16, 16

    configs = [
        dict(inp=4, oup=4, stride=1, expand_ratio=6, dilation=1),  # expand + residual
        dict(inp=4, oup=4, stride=1, expand_ratio=1, dilation=1),  # no-expansion branch
        dict(inp=4, oup=8, stride=2, expand_ratio=6, dilation=1),  # strided, no residual
        dict(inp=4, oup=4, stride=1, expand_ratio=6, dilation=2),  # dilated depthwise
    ]

    for i, cfg in enumerate(configs):
        kx, kparam = jax.random.split(jax.random.fold_in(key, i))
        x = jax.random.normal(kx, (B, cfg["inp"], H, W), dtype=jnp.float32)
        params = init_params(kparam, cfg["inp"], cfg["oup"], cfg["expand_ratio"])
        fp = fold_params(params, has_expand=cfg["expand_ratio"] != 1)
        kp = pack_kernel_params(fp, H=H, W=W, stride=cfg["stride"],
                                dilation=cfg["dilation"],
                                has_expand=cfg["expand_ratio"] != 1)

        out = inverted_residual_forward(
            x, kp, inp=cfg["inp"], oup=cfg["oup"], stride=cfg["stride"],
            expand_ratio=cfg["expand_ratio"], dilation=cfg["dilation"])
        out = jax.block_until_ready(out)

        ref = reference_forward(
            x, fp, inp=cfg["inp"], oup=cfg["oup"], stride=cfg["stride"],
            expand_ratio=cfg["expand_ratio"], dilation=cfg["dilation"])

        Ho = (H - 1) // cfg["stride"] + 1
        Wo = (W - 1) // cfg["stride"] + 1
        assert out.shape == ref.shape == (B, cfg["oup"], Ho, Wo)
        err = jnp.max(jnp.abs(out - ref))
        assert jnp.allclose(out, ref, atol=5e-2, rtol=5e-2), (
            f"config {i}: mismatch vs reference, max abs err {err}")

    print("KERNEL_OK")
</pallas_src>

<mosaic_0001>
module attributes {stable_mosaic.version = 11 : i64} {
  func.func @kernel(%arg0: i32, %arg1: memref<1x4x256xbf16, #tpu.memory_space<vmem>>, %arg2: memref<24x4xbf16, #tpu.memory_space<vmem>>, %arg3: memref<24x1xf32, #tpu.memory_space<vmem>>, %arg4: memref<24x9xf32, #tpu.memory_space<vmem>>, %arg5: memref<9x1x256xf32, #tpu.memory_space<vmem>>, %arg6: memref<24x1xf32, #tpu.memory_space<vmem>>, %arg7: memref<4x24xbf16, #tpu.memory_space<vmem>>, %arg8: memref<4x1xf32, #tpu.memory_space<vmem>>, %arg9: memref<1x4x256xf32, #tpu.memory_space<vmem>>, %arg10: memref<24x512xbf16, #tpu.memory_space<vmem>>) attributes {dimension_semantics = [#tpu.dimension_semantics<parallel>], iteration_bounds = array<i64: 2>, scalar_prefetch = 0 : i64, scratch_operands = 1 : i64, tpu.core_type = #tpu.core_type<tc>, window_params = [{transform_indices = @transform_0, window_bounds = array<i64: 1, 4, 256>}, {pipeline_mode = #tpu.pipeline_mode<synchronous>, transform_indices = @transform_1, window_bounds = array<i64: 24, 4>}, {pipeline_mode = #tpu.pipeline_mode<synchronous>, transform_indices = @transform_2, window_bounds = array<i64: 24, 1>}, {pipeline_mode = #tpu.pipeline_mode<synchronous>, transform_indices = @transform_3, window_bounds = array<i64: 24, 9>}, {pipeline_mode = #tpu.pipeline_mode<synchronous>, transform_indices = @transform_4, window_bounds = array<i64: 9, 1, 256>}, {pipeline_mode = #tpu.pipeline_mode<synchronous>, transform_indices = @transform_5, window_bounds = array<i64: 24, 1>}, {pipeline_mode = #tpu.pipeline_mode<synchronous>, transform_indices = @transform_6, window_bounds = array<i64: 4, 24>}, {pipeline_mode = #tpu.pipeline_mode<synchronous>, transform_indices = @transform_7, window_bounds = array<i64: 4, 1>}, {transform_indices = @transform_8, window_bounds = array<i64: 1, 4, 256>}]} {
    %c0 = arith.constant 0 : index
    %c0_0 = arith.constant 0 : index
    %c0_1 = arith.constant 0 : index
    %0 = vector.load %arg1[%c0, %c0_0, %c0_1] : memref<1x4x256xbf16, #tpu.memory_space<vmem>>, vector<1x4x256xbf16>
    %1 = vector.shape_cast %0 : vector<1x4x256xbf16> to vector<4x256xbf16>
    %c0_2 = arith.constant 0 : index
    %c0_3 = arith.constant 0 : index
    %2 = vector.load %arg2[%c0_2, %c0_3] : memref<24x4xbf16, #tpu.memory_space<vmem>>, vector<24x4xbf16>
    %cst = arith.constant dense<0.000000e+00> : vector<24x256xf32>
    %3 = tpu.matmul %2, %1, %cst {dimension_numbers = #tpu.dot_dimension_numbers<[1], [0], [0], [1], [0, 0, 1, 1], [], []>} : vector<24x4xbf16>, vector<4x256xbf16>, vector<24x256xf32> -> vector<24x256xf32>
    %c0_4 = arith.constant 0 : index
    %c0_5 = arith.constant 0 : index
    %4 = vector.load %arg3[%c0_4, %c0_5] : memref<24x1xf32, #tpu.memory_space<vmem>>, vector<24x1xf32>
    %5 = vector.broadcast %4 : vector<24x1xf32> to vector<24x256xf32>
    %6 = arith.addf %3, %5 : vector<24x256xf32>
    %cst_6 = arith.constant 0.000000e+00 : f32
    %cst_7 = arith.constant 6.000000e+00 : f32
    %7 = vector.broadcast %cst_6 : f32 to vector<24x256xf32>
    %8 = arith.maximumf %7, %6 : vector<24x256xf32>
    %9 = vector.broadcast %cst_7 : f32 to vector<24x256xf32>
    %10 = arith.minimumf %9, %8 : vector<24x256xf32>
    %11 = arith.truncf %10 : vector<24x256xf32> to vector<24x256xbf16>
    %cst_8 = arith.constant 0.000000e+00 : bf16
    %12 = vector.broadcast %cst_8 : bf16 to vector<24x128xbf16>
    %c0_9 = arith.constant 0 : index
    %c0_10 = arith.constant 0 : index
    %13 = vector.load %arg10[%c0_9, %c0_10] : memref<24x512xbf16, #tpu.memory_space<vmem>>, vector<24x128xbf16>
    tpu.vector_store %arg10[%c0_9, %c0_10], %12 {strides = array<i32>} : memref<24x512xbf16, #tpu.memory_space<vmem>>, vector<24x128xbf16>,
    %cst_11 = arith.constant 0.000000e+00 : bf16
    %14 = vector.broadcast %cst_11 : bf16 to vector<24x128xbf16>
    %c0_12 = arith.constant 0 : index
    %c384 = arith.constant 384 : index
    %15 = vector.load %arg10[%c0_12, %c384] : memref<24x512xbf16, #tpu.memory_space<vmem>>, vector<24x128xbf16>
    tpu.vector_store %arg10[%c0_12, %c384], %14 {strides = array<i32>} : memref<24x512xbf16, #tpu.memory_space<vmem>>, vector<24x128xbf16>,
    %c0_13 = arith.constant 0 : index
    %c128 = arith.constant 128 : index
    %16 = vector.load %arg10[%c0_13, %c128] : memref<24x512xbf16, #tpu.memory_space<vmem>>, vector<24x256xbf16>
    tpu.vector_store %arg10[%c0_13, %c128], %11 {strides = array<i32>} : memref<24x512xbf16, #tpu.memory_space<vmem>>, vector<24x256xbf16>,
    %c0_14 = arith.constant 0 : index
    %c0_15 = arith.constant 0 : index
    %17 = vector.load %arg4[%c0_14, %c0_15] : memref<24x9xf32, #tpu.memory_space<vmem>>, vector<24x9xf32>
    %c0_16 = arith.constant 0 : index
    %c0_17 = arith.constant 0 : index
    %c0_18 = arith.constant 0 : index
    %18 = vector.load %arg5[%c0_16, %c0_17, %c0_18] : memref<9x1x256xf32, #tpu.memory_space<vmem>>, vector<9x1x256xf32>
    %cst_19 = arith.constant 0.000000e+00 : f32
    %19 = vector.broadcast %cst_19 : f32 to vector<24x256xf32>
    %c0_20 = arith.constant 0 : index
    %c111 = arith.constant 111 : index
    %20 = vector.load %arg10[%c0_20, %c111] : memref<24x512xbf16, #tpu.memory_space<vmem>>, vector<24x256xbf16>
    %21 = arith.extf %20 : vector<24x256xbf16> to vector<24x256xf32>
    %22 = vector.extract_strided_slice %18 {offsets = [0, 0, 0], sizes = [1, 1, 256], strides = [1, 1, 1]} : vector<9x1x256xf32> to vector<1x1x256xf32>
    %23 = vector.shape_cast %22 : vector<1x1x256xf32> to vector<1x256xf32>
    %24 = vector.broadcast %23 : vector<1x256xf32> to vector<24x256xf32>
    %25 = arith.mulf %21, %24 : vector<24x256xf32>
    %26 = vector.extract_strided_slice %17 {offsets = [0, 0], sizes = [24, 1], strides = [1, 1]} : vector<24x9xf32> to vector<24x1xf32>
    %27 = vector.broadcast %26 : vector<24x1xf32> to vector<24x256xf32>
    %28 = arith.mulf %25, %27 : vector<24x256xf32>
    %29 = arith.addf %19, %28 : vector<24x256xf32>
    %c0_21 = arith.constant 0 : index
    %c112 = arith.constant 112 : index
    %30 = vector.load %arg10[%c0_21, %c112] : memref<24x512xbf16, #tpu.memory_space<vmem>>, vector<24x256xbf16>
    %31 = arith.extf %30 : vector<24x256xbf16> to vector<24x256xf32>
    %32 = vector.extract_strided_slice %18 {offsets = [1, 0, 0], sizes = [1, 1, 256], strides = [1, 1, 1]} : vector<9x1x256xf32> to vector<1x1x256xf32>
    %33 = vector.shape_cast %32 : vector<1x1x256xf32> to vector<1x256xf32>
    %34 = vector.broadcast %33 : vector<1x256xf32> to vector<24x256xf32>
    %35 = arith.mulf %31, %34 : vector<24x256xf32>
    %36 = vector.extract_strided_slice %17 {offsets = [0, 1], sizes = [24, 1], strides = [1, 1]} : vector<24x9xf32> to vector<24x1xf32>
    %37 = vector.broadcast %36 : vector<24x1xf32> to vector<24x256xf32>
    %38 = arith.mulf %35, %37 : vector<24x256xf32>
    %39 = arith.addf %29, %38 : vector<24x256xf32>
    %c0_22 = arith.constant 0 : index
    %c113 = arith.constant 113 : index
    %40 = vector.load %arg10[%c0_22, %c113] : memref<24x512xbf16, #tpu.memory_space<vmem>>, vector<24x256xbf16>
    %41 = arith.extf %40 : vector<24x256xbf16> to vector<24x256xf32>
    %42 = vector.extract_strided_slice %18 {offsets = [2, 0, 0], sizes = [1, 1, 256], strides = [1, 1, 1]} : vector<9x1x256xf32> to vector<1x1x256xf32>
    %43 = vector.shape_cast %42 : vector<1x1x256xf32> to vector<1x256xf32>
    %44 = vector.broadcast %43 : vector<1x256xf32> to vector<24x256xf32>
    %45 = arith.mulf %41, %44 : vector<24x256xf32>
    %46 = vector.extract_strided_slice %17 {offsets = [0, 2], sizes = [24, 1], strides = [1, 1]} : vector<24x9xf32> to vector<24x1xf32>
    %47 = vector.broadcast %46 : vector<24x1xf32> to vector<24x256xf32>
    %48 = arith.mulf %45, %47 : vector<24x256xf32>
    %49 = arith.addf %39, %48 : vector<24x256xf32>
    %c0_23 = arith.constant 0 : index
    %c127 = arith.constant 127 : index
    %50 = vector.load %arg10[%c0_23, %c127] : memref<24x512xbf16, #tpu.memory_space<vmem>>, vector<24x256xbf16>
    %51 = arith.extf %50 : vector<24x256xbf16> to vector<24x256xf32>
    %52 = vector.extract_strided_slice %18 {offsets = [3, 0, 0], sizes = [1, 1, 256], strides = [1, 1, 1]} : vector<9x1x256xf32> to vector<1x1x256xf32>
    %53 = vector.shape_cast %52 : vector<1x1x256xf32> to vector<1x256xf32>
    %54 = vector.broadcast %53 : vector<1x256xf32> to vector<24x256xf32>
    %55 = arith.mulf %51, %54 : vector<24x256xf32>
    %56 = vector.extract_strided_slice %17 {offsets = [0, 3], sizes = [24, 1], strides = [1, 1]} : vector<24x9xf32> to vector<24x1xf32>
    %57 = vector.broadcast %56 : vector<24x1xf32> to vector<24x256xf32>
    %58 = arith.mulf %55, %57 : vector<24x256xf32>
    %59 = arith.addf %49, %58 : vector<24x256xf32>
    %c0_24 = arith.constant 0 : index
    %c128_25 = arith.constant 128 : index
    %60 = vector.load %arg10[%c0_24, %c128_25] : memref<24x512xbf16, #tpu.memory_space<vmem>>, vector<24x256xbf16>
    %61 = arith.extf %60 : vector<24x256xbf16> to vector<24x256xf32>
    %62 = vector.extract_strided_slice %17 {offsets = [0, 4], sizes = [24, 1], strides = [1, 1]} : vector<24x9xf32> to vector<24x1xf32>
    %63 = vector.broadcast %62 : vector<24x1xf32> to vector<24x256xf32>
    %64 = arith.mulf %61, %63 : vector<24x256xf32>
    %65 = arith.addf %59, %64 : vector<24x256xf32>
    %c0_26 = arith.constant 0 : index
    %c129 = arith.constant 129 : index
    %66 = vector.load %arg10[%c0_26, %c129] : memref<24x512xbf16, #tpu.memory_space<vmem>>, vector<24x256xbf16>
    %67 = arith.extf %66 : vector<24x256xbf16> to vector<24x256xf32>
    %68 = vector.extract_strided_slice %18 {offsets = [5, 0, 0], sizes = [1, 1, 256], strides = [1, 1, 1]} : vector<9x1x256xf32> to vector<1x1x256xf32>
    %69 = vector.shape_cast %68 : vector<1x1x256xf32> to vector<1x256xf32>
    %70 = vector.broadcast %69 : vector<1x256xf32> to vector<24x256xf32>
    %71 = arith.mulf %67, %70 : vector<24x256xf32>
    %72 = vector.extract_strided_slice %17 {offsets = [0, 5], sizes = [24, 1], strides = [1, 1]} : vector<24x9xf32> to vector<24x1xf32>
    %73 = vector.broadcast %72 : vector<24x1xf32> to vector<24x256xf32>
    %74 = arith.mulf %71, %73 : vector<24x256xf32>
    %75 = arith.addf %65, %74 : vector<24x256xf32>
    %c0_27 = arith.constant 0 : index
    %c143 = arith.constant 143 : index
    %76 = vector.load %arg10[%c0_27, %c143] : memref<24x512xbf16, #tpu.memory_space<vmem>>, vector<24x256xbf16>
    %77 = arith.extf %76 : vector<24x256xbf16> to vector<24x256xf32>
    %78 = vector.extract_strided_slice %18 {offsets = [6, 0, 0], sizes = [1, 1, 256], strides = [1, 1, 1]} : vector<9x1x256xf32> to vector<1x1x256xf32>
    %79 = vector.shape_cast %78 : vector<1x1x256xf32> to vector<1x256xf32>
    %80 = vector.broadcast %79 : vector<1x256xf32> to vector<24x256xf32>
    %81 = arith.mulf %77, %80 : vector<24x256xf32>
    %82 = vector.extract_strided_slice %17 {offsets = [0, 6], sizes = [24, 1], strides = [1, 1]} : vector<24x9xf32> to vector<24x1xf32>
    %83 = vector.broadcast %82 : vector<24x1xf32> to vector<24x256xf32>
    %84 = arith.mulf %81, %83 : vector<24x256xf32>
    %85 = arith.addf %75, %84 : vector<24x256xf32>
    %c0_28 = arith.constant 0 : index
    %c144 = arith.constant 144 : index
    %86 = vector.load %arg10[%c0_28, %c144] : memref<24x512xbf16, #tpu.memory_space<vmem>>, vector<24x256xbf16>
    %87 = arith.extf %86 : vector<24x256xbf16> to vector<24x256xf32>
    %88 = vector.extract_strided_slice %18 {offsets = [7, 0, 0], sizes = [1, 1, 256], strides = [1, 1, 1]} : vector<9x1x256xf32> to vector<1x1x256xf32>
    %89 = vector.shape_cast %88 : vector<1x1x256xf32> to vector<1x256xf32>
    %90 = vector.broadcast %89 : vector<1x256xf32> to vector<24x256xf32>
    %91 = arith.mulf %87, %90 : vector<24x256xf32>
    %92 = vector.extract_strided_slice %17 {offsets = [0, 7], sizes = [24, 1], strides = [1, 1]} : vector<24x9xf32> to vector<24x1xf32>
    %93 = vector.broadcast %92 : vector<24x1xf32> to vector<24x256xf32>
    %94 = arith.mulf %91, %93 : vector<24x256xf32>
    %95 = arith.addf %85, %94 : vector<24x256xf32>
    %c0_29 = arith.constant 0 : index
    %c145 = arith.constant 145 : index
    %96 = vector.load %arg10[%c0_29, %c145] : memref<24x512xbf16, #tpu.memory_space<vmem>>, vector<24x256xbf16>
    %97 = arith.extf %96 : vector<24x256xbf16> to vector<24x256xf32>
    %98 = vector.extract_strided_slice %18 {offsets = [8, 0, 0], sizes = [1, 1, 256], strides = [1, 1, 1]} : vector<9x1x256xf32> to vector<1x1x256xf32>
    %99 = vector.shape_cast %98 : vector<1x1x256xf32> to vector<1x256xf32>
    %100 = vector.broadcast %99 : vector<1x256xf32> to vector<24x256xf32>
    %101 = arith.mulf %97, %100 : vector<24x256xf32>
    %102 = vector.extract_strided_slice %17 {offsets = [0, 8], sizes = [24, 1], strides = [1, 1]} : vector<24x9xf32> to vector<24x1xf32>
    %103 = vector.broadcast %102 : vector<24x1xf32> to vector<24x256xf32>
    %104 = arith.mulf %101, %103 : vector<24x256xf32>
    %105 = arith.addf %95, %104 : vector<24x256xf32>
    %c0_30 = arith.constant 0 : index
    %c0_31 = arith.constant 0 : index
    %106 = vector.load %arg6[%c0_30, %c0_31] : memref<24x1xf32, #tpu.memory_space<vmem>>, vector<24x1xf32>
    %107 = vector.broadcast %106 : vector<24x1xf32> to vector<24x256xf32>
    %108 = arith.addf %105, %107 : vector<24x256xf32>
    %cst_32 = arith.constant 0.000000e+00 : f32
    %cst_33 = arith.constant 6.000000e+00 : f32
    %109 = vector.broadcast %cst_32 : f32 to vector<24x256xf32>
    %110 = arith.maximumf %109, %108 : vector<24x256xf32>
    %111 = vector.broadcast %cst_33 : f32 to vector<24x256xf32>
    %112 = arith.minimumf %111, %110 : vector<24x256xf32>
    %113 = arith.truncf %112 : vector<24x256xf32> to vector<24x256xbf16>
    %c0_34 = arith.constant 0 : index
    %c0_35 = arith.constant 0 : index
    %114 = vector.load %arg7[%c0_34, %c0_35] : memref<4x24xbf16, #tpu.memory_space<vmem>>, vector<4x24xbf16>
    %cst_36 = arith.constant dense<0.000000e+00> : vector<4x256xf32>
    %115 = tpu.matmul %114, %113, %cst_36 {dimension_numbers = #tpu.dot_dimension_numbers<[1], [0], [0], [1], [0, 0, 1, 1], [], []>} : vector<4x24xbf16>, vector<24x256xbf16>, vector<4x256xf32> -> vector<4x256xf32>
    %c0_37 = arith.constant 0 : index
    %c0_38 = arith.constant 0 : index
    %116 = vector.load %arg8[%c0_37, %c0_38] : memref<4x1xf32, #tpu.memory_space<vmem>>, vector<4x1xf32>
    %117 = vector.broadcast %116 : vector<4x1xf32> to vector<4x256xf32>
    %118 = arith.addf %115, %117 : vector<4x256xf32>
    %119 = arith.extf %1 : vector<4x256xbf16> to vector<4x256xf32>
    %120 = arith.addf %118, %119 : vector<4x256xf32>
    %c0_39 = arith.constant 0 : index
    %c0_40 = arith.constant 0 : index
    %c0_41 = arith.constant 0 : index
    %121 = vector.load %arg9[%c0_39, %c0_40, %c0_41] : memref<1x4x256xf32, #tpu.memory_space<vmem>>, vector<1x4x256xf32>
    %122 = vector.shape_cast %121 : vector<1x4x256xf32> to vector<4x256xf32>
    %123 = vector.shape_cast %120 : vector<4x256xf32> to vector<1x4x256xf32>
    tpu.vector_store %arg9[%c0_39, %c0_40, %c0_41], %123 {strides = array<i32>} : memref<1x4x256xf32, #tpu.memory_space<vmem>>, vector<1x4x256xf32>,
    return
  }
  func.func @transform_0(%arg0: i32) -> (i32, i32, i32) {
    %c0_i32 = arith.constant 0 : i32
    %c0_i32_0 = arith.constant 0 : i32
    %c0_i32_1 = arith.constant 0 : i32
    return %arg0, %c0_i32, %c0_i32_0 : i32, i32, i32
  }
  func.func @transform_1(%arg0: i32) -> (i32, i32) {
    %c0_i32 = arith.constant 0 : i32
    %c0_i32_0 = arith.constant 0 : i32
    %c0_i32_1 = arith.constant 0 : i32
    return %c0_i32, %c0_i32_0 : i32, i32
  }
  func.func @transform_2(%arg0: i32) -> (i32, i32) {
    %c0_i32 = arith.constant 0 : i32
    %c0_i32_0 = arith.constant 0 : i32
    %c0_i32_1 = arith.constant 0 : i32
    return %c0_i32, %c0_i32_0 : i32, i32
  }
  func.func @transform_3(%arg0: i32) -> (i32, i32) {
    %c0_i32 = arith.constant 0 : i32
    %c0_i32_0 = arith.constant 0 : i32
    %c0_i32_1 = arith.constant 0 : i32
    return %c0_i32, %c0_i32_0 : i32, i32
  }
  func.func @transform_4(%arg0: i32) -> (i32, i32, i32) {
    %c0_i32 = arith.constant 0 : i32
    %c0_i32_0 = arith.constant 0 : i32
    %c0_i32_1 = arith.constant 0 : i32
    %c0_i32_2 = arith.constant 0 : i32
    return %c0_i32, %c0_i32_0, %c0_i32_1 : i32, i32, i32
  }
  func.func @transform_5(%arg0: i32) -> (i32, i32) {
    %c0_i32 = arith.constant 0 : i32
    %c0_i32_0 = arith.constant 0 : i32
    %c0_i32_1 = arith.constant 0 : i32
    return %c0_i32, %c0_i32_0 : i32, i32
  }
  func.func @transform_6(%arg0: i32) -> (i32, i32) {
    %c0_i32 = arith.constant 0 : i32
    %c0_i32_0 = arith.constant 0 : i32
    %c0_i32_1 = arith.constant 0 : i32
    return %c0_i32, %c0_i32_0 : i32, i32
  }
  func.func @transform_7(%arg0: i32) -> (i32, i32) {
    %c0_i32 = arith.constant 0 : i32
    %c0_i32_0 = arith.constant 0 : i32
    %c0_i32_1 = arith.constant 0 : i32
    return %c0_i32, %c0_i32_0 : i32, i32
  }
  func.func @transform_8(%arg0: i32) -> (i32, i32, i32) {
    %c0_i32 = arith.constant 0 : i32
    %c0_i32_0 = arith.constant 0 : i32
    %c0_i32_1 = arith.constant 0 : i32
    return %arg0, %c0_i32, %c0_i32_0 : i32, i32, i32
  }
}

</mosaic_0001>

<bundles_post_ra>
// kernel: tpu_custom_call.1
= control target key start
LH: loop header
LB: loop body
LE: loop exit
PB: predicated region body
PF: predicated region fallthrough
CT: control target
= control target key end

     0   :  { %13 = vsyncpa [#allocation4], 0  ;;  %s2566_s0 = inlined_call_operand.vmem [shape: bf16[2,4,256], index: 0, kind: input, shape index: {}]   ;;  %s2567_s1 = inlined_call_operand.vmem [shape: bf16[24,4], index: 1, kind: input, shape index: {}]   ;;  %s2568_s2 = inlined_call_operand.vmem [shape: f32[24,1], index: 2, kind: input, shape index: {}]   ;;  %s2569_s3 = inlined_call_operand.vmem [shape: f32[24,9], index: 3, kind: input, shape index: {}]   ;;  %s2570_s4 = inlined_call_operand.vmem [shape: f32[9,1,256], index: 4, kind: input, shape index: {}]   ;;  %s2571_s5 = inlined_call_operand.vmem [shape: f32[24,1], index: 5, kind: input, shape index: {}]   ;;  %s2572_s6 = inlined_call_operand.vmem [shape: bf16[4,24], index: 6, kind: input, shape index: {}]   ;;  %s2573_s7 = inlined_call_operand.vmem [shape: f32[4,1], index: 7, kind: input, shape index: {}]   ;;  %s2574_s8 = inlined_call_operand.hbm [shape: f32[2,4,256], index: 8, kind: output, shape index: {}]  }
   0x1   :  { %15 = vsyncpa [#allocation4 + $0x1], 0  ;;  %s1686_s27 = smov 0   ;;  %s1688_s28 = smov 0  }
   0x2   :  { %s1690_s29 = smov 0   ;;  %s1692_s30 = smov 0  }
   0x3 LB: > { %s1707_s9 = sadd.s32 4294967295, %s1617_s30   ;;  %s1439_s10 = sadd.s32 4294967294, %s1617_s30   ;;  %s1617_s30 = sphi %s1692_s30, %s2637_s30   ;;  %s1613_s29 = sphi %s1690_s29, %s2636_s29   ;;  %s1609_s28 = sphi %s1688_s28, %s2635_s28   ;;  %s1605_s27 = sphi %s1686_s27, %s2634_s27  }
   0x4   : > { %s1711_s11 = sadd.s32 1, %s1617_s30   ;;  %s201_s12 = sadd.s32 1, %s1613_s29 }
   0x5   : > { %s198_s13 = ssub.s32 %s1617_s30, %s1711_s11  ;;  %p211_p0 = scmp.ne.s32.totalorder %s1613_s29, %s1609_s28 }
   0x6   : > { %p199_p1 = scmp.eq.s32.totalorder %s198_s13, 0  ;;  %p212_p2 = scmp.eq.s32.totalorder %s1707_s9, 1 }
   0x7   : > { %p217_p3 = scmp.ne.s32.totalorder %s1609_s28, %s1605_s27  ;;  %p218_p4 = scmp.eq.s32.totalorder %s1439_s10, 1 }
   0x8   : > { %s1722_s14 = scalar_select %p199_p1, %s1613_s29, %s201_s12  }
   0x9   : > { %p1724_p5 = por %p212_p2, %p211_p0  ;;  %p1728_p6 = por %p218_p4, %p217_p3 }
   0xa   : > { %p1442_p7 = scmp.ge.s32.totalorder %s1617_s30, 1  ;;  %p265_p8 = scmp.lt.s32.totalorder %s1617_s30, 3 }
   0xc   : > { %p266_p9 = pnand %p1442_p7, %p265_p8 }
   0xe   : > { %269 = sbr.rel (%p266_p9) target bundleno = 829 (0x33d), region = 52 }
  0x13   : > { %v311_v0 = vld [vmem:[%s2568_s2 + $0x10] sm:$0xff]  ;;  %v309_v1 = vld [vmem:[%s2568_s2] sm:$0xff]  ;;  %v2578_v3 = vmov 0   ;;  %p299_p10 = scmp.lt.s32.totalorder %s1707_s9, 1  ;;  %s1620_s23 = smov 111   ;;  %v310_v6 = vld [vmem:[%s2568_s2 + $0x8] sm:$0xff] }
  0x14   : > { %v414_v2 = vld [vmem:[%s2570_s4] sm:$0x3]  ;;  %1526 = vset.pattern.permute.xlu1 %v2578_v3  ;;  %402 = vst [vmem:[#allocation2] sm:$0xf] %v2578_v3  ;;  %1525 = vset.pattern.permute.xlu0 %v2578_v3  ;;  %v415_v9 = vld [vmem:[%s2570_s4 + $0x2] sm:$0x3] }
  0x15   : > { %v439_v4 = vperm.slane %v414_v2, 1  ;;  %403 = vst [vmem:[#allocation2 + $0x10] sm:$0xf] %v2578_v3  ;;  %324 = vperm.xlu1 %1526, %v311_v0   ;;  %314 = vperm.xlu0 %1525, %v309_v1   ;;  %s300_s24 = scalar_select %p299_p10, %s1707_s9, 1  ;;  %v438_v5 = vperm.slane %v414_v2, 0  ;;  %v1764_v7 = vld [vmem:[%s2569_s3] sm:$0xff] }
  0x16   : > { %404 = vst [vmem:[#allocation2 + $0x20] sm:$0xf] %v2578_v3  ;;  %1527 = vset.pattern.permute.xlu2 %v2578_v3  ;;  %vm346_vm0 = vcmask 1041408   ;;  %v1774_v11 = vld [vmem:[%s2569_s3 + $0x10] sm:$0xff]  ;;  %v493_v12 = vperm.slane %v415_v9, 1  ;;  %v492_v13 = vperm.slane %v415_v9, 0 }
  0x17   : > { %442 = vrot.lane.b32.xlu2 %v439_v4, %s1620_s23  ;;  %405 = vst [vmem:[#allocation2 + $0xc] sm:$0xf] %v2578_v3  ;;  %s1461_s25 = sshll.u32 %s300_s24, 2  ;;  %v1462_v18 = vld [vmem:[%s2567_s1] sm:$0xff]  ;;  %vm339_vm1 = vcmask 31744   ;;  %s1621_s10 = smov 112  }
  0x18   : > { %406 = vst [vmem:[#allocation2 + $0x1c] sm:$0xf] %v2578_v3  ;;  %s303_s17 = scalar_lea.vmem %s2566_s0, %s1461_s25  ;;  %v1622_v19 = vmov 1   ;;  %v1787_v20 = vld [vmem:[%s2569_s3 + $0x8] sm:$0xff]  ;;  %v416_v22 = vld [vmem:[%s2570_s4 + $0x4] sm:$0x3] }
  0x19   : > { %407 = vst [vmem:[#allocation2 + $0x2c] sm:$0xf] %v2578_v3  ;;  %v305_v8 = vld [vmem:[%s303_s17] sm:$0xf]  ;;  %v308_v21 = vld [vmem:[%s2567_s1 + $0x8] sm:$0xf] }
  0x1a   : > { %336 = vst [vmem:[#allocation1] ss:$4 sm:$0xff] %v305_v8  ;;  %v1348_v10 = vunpack.c.l.bf16 %v305_v8  ;;  %v332_v23 = vunpack.c.l.b16 %v308_v21  ;;  %v587_v24 = vperm.slane %v416_v22, 1  ;;  %v586_v25 = vperm.slane %v416_v22, 0  ;;  %s1623_s21 = smov 113   ;;  %s1626_s12 = smov 127  }
  0x1b   : > { %v1624_v27 = vmov 2   ;;  %v417_v28 = vld [vmem:[%s2570_s4 + $0x6] sm:$0x3]  ;;  %v1625_v29 = vmov 3   ;;  %v418_v32 = vld [vmem:[%s2570_s4 + $0xa] sm:$0x3] }
  0x1c   : > { %v334_v26 = vpack.c.b16 %v332_v23, %v332_v23  ;;  %v681_v30 = vperm.slane %v417_v28, 1  ;;  %v680_v31 = vperm.slane %v417_v28, 0  ;;  %v854_v33 = vperm.slane %v418_v32, 1  ;;  %s1627_s13 = smov 1   ;;  %v419_v34 = vld [vmem:[%s2570_s4 + $0xc] sm:$0x3] }
  0x1d   : > { %440 = vrot.lane.b32.xlu1 %v438_v5, %s1620_s23  ;;  %319 = vperm.xlu0 %1525, %v310_v6   ;;  %v1628_v35 = vmov 4   ;;  %v948_v36 = vperm.slane %v419_v34, 1  ;;  %s1629_s19 = smov 15   ;;  %v853_v37 = vperm.slane %v418_v32, 0  ;;  %v420_v38 = vld [vmem:[%s2570_s4 + $0xe] sm:$0x3] }
  0x1e   : > { %v1042_v39 = vperm.slane %v420_v38, 1  ;;  %s1630_s22 = smov 16   ;;  %v947_v40 = vperm.slane %v419_v34, 0  ;;  %v1631_v41 = vmov 5   ;;  %v1041_v42 = vperm.slane %v420_v38, 0  ;;  %s1633_s26 = smov 17  }
  0x1f   : > { %460 = vperm.xlu2 %1527, %v1764_v7   ;;  %v421_v43 = vld [vmem:[%s2570_s4 + $0x10] sm:$0x3]  ;;  %v1632_v45 = vmov 6   ;;  %v2575_v48 = vmov 7   ;;  %v2576_v51 = vmov 8   ;;  %vm498_vm2 = vcmask 916480  }
  0x20   : > { %v1136_v44 = vperm.slane %v421_v43, 1  ;;  %v1135_v46 = vperm.slane %v421_v43, 0  ;;  %vm592_vm3 = vcmask 924672   ;;  %vm560_vm4 = vcmask 1039360   ;;  %s1637_s17 = smov 110   ;;  %s1638_s18 = smov 96  }
  0x21   : > { %v337_v14 = vld.sshfl [vmem:[#allocation1] sm:$0xff pattern:$0x73625140]  ;;  %v338_v15 = vld.sshfl [vmem:[#allocation1 + $0x8] sm:$0xff pattern:$0x73625140] }
  0x22   : > { %v347_v16 = vsel %vm346_vm0, %v337_v14, 0  ;;  %v349_v17 = vsel %vm346_vm0, %v338_v15, 0  ;;  %1350 = vst [vmem:[#allocation1] ss:$2 sm:$0xff] %v1348_v10  ;;  %vm953_vm5 = vcmask 121856   ;;  %vm444_vm6 = vcmask 908288  }
  0x23   : > { %358 = vmatpush.bf16.msra.mxu0 %v347_v16  ;;  %376 = vmatpush.bf16.msra.mxu1 %v349_v17  ;;  %vm1047_vm7 = vcmask 130048   ;;  %vm1141_vm8 = vcmask 138240   ;;  %vm859_vm9 = vcmask 7168   ;;  %vm654_vm10 = vcmask 1031168  }
  0x24   : > { %vm921_vm11 = vcmask 900096   ;;  %vm1015_vm12 = vcmask 785408   ;;  %vm1109_vm13 = vcmask 777216   ;;  %vm1203_vm14 = vcmask 769024  }
  0x25   : > { %470 = vperm.xlu1 %1526, %v1774_v11   ;;  %496 = vrot.lane.b32.xlu0 %v493_v12, %s1621_s10  ;;  %vm1315_vm15 = vcmask 1043456   ;;  %vm1311_vm0 = vcmask 195584  }
  0x26   : > { %1530 = vset.pattern.permute.xlu0 %v1622_v19  ;;  %1450 = vmatmul.msk.bf16.vlgmr.msra.gmra.mxu0 %vm339_vm1, %v1462_v18 }
  0x27   : > { %494 = vrot.lane.b32.xlu2 %v492_v13, %s1621_s10  ;;  %1452 = vmatmul.msk.bf16.vlgmr.msra.gmra.mxu1 %vm339_vm1, %v1462_v18 }
  0x28   : > { %1529 = vset.pattern.permute.xlu2 %v1622_v19 }
  0x2d   : > { %1528 = vset.pattern.permute.xlu1 %v1622_v19  ;;  %521 = vperm.xlu0 %1530, %v1774_v11  }
  0x2e   : > { %513 = vperm.xlu1 %1528, %v1764_v7  }
  0x2f   : > { %517 = vperm.xlu2 %1529, %v1787_v20  }
  0x35   : > { %590 = vrot.lane.b32.xlu0 %v587_v24, %s1623_s21 }
  0x36   : > { %1531 = vset.pattern.permute.xlu1 %v1624_v27  ;;  %1451 = vmatmul.msk.bf16.gmra.mxu0 %vm339_vm1, %v334_v26 }
  0x37   : > { %588 = vrot.lane.b32.xlu2 %v586_v25, %s1623_s21  ;;  %1453 = vmatmul.msk.bf16.gmra.mxu1 %vm339_vm1, %v334_v26 }
  0x38   : > { %607 = vperm.xlu1 %1531, %v1764_v7   ;;  %1533 = vset.pattern.permute.xlu0 %v1624_v27 }
  0x39   : > { %1532 = vset.pattern.permute.xlu2 %v1624_v27 }
  0x3d   : > { %615 = vperm.xlu0 %1533, %v1774_v11  }
  0x3f   : > { %611 = vperm.xlu2 %1532, %v1787_v20  }
  0x40   : > { %1534 = vset.pattern.permute.xlu1 %v1625_v29 }
  0x41   : > { %700 = vperm.xlu1 %1534, %v1764_v7  }
  0x45   : > { %684 = vrot.lane.b32.xlu0 %v681_v30, %s1626_s12 }
  0x46   : > { %1536 = vset.pattern.permute.xlu0 %v1625_v29 }
  0x47   : > { %682 = vrot.lane.b32.xlu2 %v680_v31, %s1626_s12 }
  0x48   : > { %1535 = vset.pattern.permute.xlu2 %v1625_v29 }
  0x49   : > { %857 = vrot.lane.b32.xlu1 %v854_v33, %s1627_s13 }
  0x4a   : > { %1541 = vset.pattern.permute.xlu1 %v1628_v35 }
  0x4d   : > { %708 = vperm.xlu0 %1536, %v1774_v11  }
  0x4f   : > { %704 = vperm.xlu2 %1535, %v1787_v20  }
  0x51   : > { %951 = vrot.lane.b32.xlu1 %v948_v36, %s1629_s19 }
  0x55   : > { %855 = vrot.lane.b32.xlu0 %v853_v37, %s1627_s13  ;;  %s1636_s13 = smov 126  }
  0x56   : > { %1540 = vset.pattern.permute.xlu0 %v1628_v35 }
  0x57   : > { %1537 = vset.pattern.permute.xlu2 %v1628_v35 }
  0x58   : > { %789 = vperm.xlu2 %1537, %v1774_v11  }
  0x59   : > { %1045 = vrot.lane.b32.xlu1 %v1042_v39, %s1630_s22 }
  0x5d   : > { %949 = vrot.lane.b32.xlu0 %v947_v40, %s1629_s19 }
  0x60   : > { %1538 = vset.pattern.permute.xlu2 %v1631_v41 }
  0x61   : > { %882 = vperm.xlu2 %1538, %v1774_v11   ;;  %785 = vperm.xlu1 %1541, %v1787_v20  }
  0x65   : > { %1043 = vrot.lane.b32.xlu0 %v1041_v42, %s1630_s22 }
  0x69   : > { %1539 = vset.pattern.permute.xlu2 %v1632_v45  ;;  %1139 = vrot.lane.b32.xlu1 %v1136_v44, %s1633_s26 }
  0x6a   : > { %976 = vperm.xlu2 %1539, %v1774_v11   ;;  %1544 = vset.pattern.permute.xlu1 %v1631_v41 }
  0x6d   : > { %781 = vperm.xlu0 %1540, %v1764_v7  }
  0x71   : > { %v1829_v47 = vpop.permute.xlu2 %442  ;;  %878 = vperm.xlu1 %1544, %v1787_v20  }
  0x72   : > { %1137 = vrot.lane.b32.xlu2 %v1135_v46, %s1633_s26 }
  0x73   : > { %1542 = vset.pattern.permute.xlu2 %v2575_v48 }
  0x75   : > { %1543 = vset.pattern.permute.xlu0 %v1631_v41 }
  0x76   : > { %874 = vperm.xlu0 %1543, %v1764_v7  }
  0x79   : > { %v1835_v49 = vpop.permute.xlu2 %460  ;;  %1546 = vset.pattern.permute.xlu1 %v1632_v45 }
  0x7a   : > { %1070 = vperm.xlu2 %1542, %v1774_v11  }
  0x7e   : > { %1548 = vset.pattern.permute.xlu0 %v2575_v48 }
  0x81   : > { %v1839_v50 = vpop.permute.xlu2 %494 }
  0x82   : > { %1545 = vset.pattern.permute.xlu2 %v2576_v51 }
  0x83   : > { %1164 = vperm.xlu2 %1545, %v1774_v11  }
  0x87   : > { %v315_v52 = vpop.permute.xlu0 %314  ;;  %v325_v53 = vpop.permute.xlu1 %324 }
  0x89   : > { %v1843_v54 = vpop.permute.xlu2 %517 }
  0x8b   : > { %1547 = vset.pattern.permute.xlu2 %v1632_v45 }
  0x8f   : > { %v320_v55 = vpop.permute.xlu0 %319  ;;  %v1845_v56 = vpop.permute.xlu1 %440 }
  0x91   : > { %v1847_v57 = vpop.permute.xlu2 %588 }
  0x97   : > { %v1849_v58 = vpop.permute.xlu0 %496  ;;  %v1851_v59 = vpop.permute.xlu1 %470 }
  0x98   : > { %v1886_v34 = vsel %vm498_vm2, %v1839_v50, %v1849_v58 }
  0x99   : > { %v1853_v60 = vpop.permute.xlu2 %611 }
  0x9f   : > { %v1855_v61 = vpop.permute.xlu0 %521 }
  0xa0   : > { %v1857_v62 = vpop.permute.xlu1 %513 }
  0xa1   : > { %v1859_v63 = vpop.permute.xlu2 %682 }
  0xa3   : > { %v360_v0 = vpop.f32.mrf.mxu0 }
  0xa4   : > { %v378_v1 = vpop.f32.mrf.mxu1  ;;  %v361_v2 = vadd.f32 %v360_v0, %v315_v52 }
  0xa5   : > { %v379_v4 = vadd.f32 %v378_v1, %v315_v52 }
  0xa6   : > { %v387_v5 = vmax.f32 %v361_v2, 0.0 }
  0xa7   : > { %v388_v6 = vmax.f32 %v379_v4, 0.0  ;;  %v1861_v8 = vpop.permute.xlu0 %590 }
  0xa8   : > { %v393_v10 = vmin.f32 %v387_v5, 6.0  ;;  %v1909_v2 = vsel %vm592_vm3, %v1847_v57, %v1861_v8 }
  0xa9   : > { %v1863_v9 = vpop.permute.xlu2 %704  ;;  %v394_v11 = vmin.f32 %v388_v6, 6.0 }
  0xaa   : > { %v1865_v12 = vpop.permute.xlu1 %607 }
  0xab   : > { %v1867_v13 = vpack.c.bf16 %v394_v11, %v393_v10  ;;  %v362_v14 = vpop.f32.mrf.mxu0 }
  0xac   : > { %v380_v15 = vpop.f32.mrf.mxu1  ;;  %v363_v16 = vadd.f32 %v362_v14, %v320_v55 }
  0xad   : > { %408 = vst [vmem:[#allocation2 + $0x4] sm:$0xff] %v1867_v13  ;;  %v381_v17 = vadd.f32 %v380_v15, %v320_v55 }
  0xae   : > { %v389_v18 = vmax.f32 %v363_v16, 0.0 }
  0xaf   : > { %v390_v19 = vmax.f32 %v381_v17, 0.0  ;;  %v1870_v21 = vpop.permute.xlu0 %615 }
  0xb0   : > { %v395_v22 = vmin.f32 %v389_v18, 6.0 }
  0xb1   : > { %v396_v23 = vmin.f32 %v390_v19, 6.0 }
  0xb2   : > { %v1872_v24 = vpop.permute.xlu2 %789 }
  0xb3   : > { %v1874_v25 = vpack.c.bf16 %v396_v23, %v395_v22  ;;  %v1876_v26 = vpop.permute.xlu1 %700  ;;  %v365_v28 = vpop.f32.mrf.mxu0 }
  0xb4   : > { %v422_v27 = vld [vmem:[#allocation2] sm:$0xff]  ;;  %v383_v29 = vpop.f32.mrf.mxu1  ;;  %v366_v30 = vadd.f32 %v365_v28, %v325_v53  ;;  %v1890_v38 = vld [vmem:[#allocation2 + $0x8] sm:$0xff]  }
  0xb5   : > { %409 = vst [vmem:[#allocation2 + $0x14] sm:$0xff] %v1874_v25  ;;  %v1879_v31 = vunpack.c.l.bf16 %v422_v27  ;;  %v1881_v32 = vunpack.c.h.bf16 %v422_v27  ;;  %v384_v33 = vadd.f32 %v383_v29, %v325_v53  ;;  %v1901_v45 = vunpack.c.l.bf16 %v1890_v38 }
  0xb6   : > { %v391_v36 = vmax.f32 %v366_v30, 0.0  ;;  %v2012_v51 = vunpack.c.h.bf16 %v1890_v38  ;;  %v2031_v38 = vsel %vm444_vm6, %v1845_v56, %v1829_v47 }
  0xb7   : > { %v1888_v35 = vpop.permute.xlu0 %684  ;;  %v392_v37 = vmax.f32 %v384_v33, 0.0  ;;  %v504_v41 = vmul.f32 %v1886_v34, %v1881_v32  ;;  %v503_v42 = vmul.f32 %v1839_v50, %v1879_v31  ;;  %v598_v10 = vmul.f32 %v1909_v2, %v1881_v32  ;;  %2590 = vst [vmem:[#allocation11_spill] sm:$0xff] %v2031_v38 }
  0xb8   : > { %v397_v39 = vmin.f32 %v391_v36, 6.0  ;;  %v505_v14 = vmul.f32 %v1849_v58, %v1901_v45  ;;  %v1939_v22 = vsel %vm560_vm4, %v1859_v63, %v1888_v35  ;;  %v597_v30 = vmul.f32 %v1847_v57, %v1879_v31 }
  0xb9   : > { %v398_v40 = vmin.f32 %v392_v37, 6.0  ;;  %v525_v52 = vmul.f32 %v1857_v62, %v504_v41  ;;  %v524_v53 = vmul.f32 %v1857_v62, %v503_v42  ;;  %v619_v19 = vmul.f32 %v1865_v12, %v598_v10 }
  0xba   : > { %v526_v23 = vmul.f32 %v1857_v62, %v505_v14  ;;  %v691_v62 = vmul.f32 %v1939_v22, %v1881_v32  ;;  %v1969_v42 = vunpack.c.l.bf16 %v1867_v13 }
  0xbb   : > { %v1896_v43 = vpop.permute.xlu2 %882  ;;  %v1898_v44 = vpop.permute.xlu1 %857  ;;  %v1903_v46 = vpack.c.bf16 %v398_v40, %v397_v39  ;;  %544 = vrot.lane.b32.xlu2 %v525_v52, %s1626_s12  ;;  %542 = vrot.lane.b32.xlu1 %v524_v53, %s1626_s12  ;;  %v1963_v40 = vunpack.c.l.bf16 %v1874_v25  ;;  %v618_v52 = vmul.f32 %v1865_v12, %v597_v30 }
  0xbc   : > { %v424_v55 = vld [vmem:[#allocation2 + $0x10] sm:$0xff]  ;;  %v367_v0 = vpop.f32.mrf.mxu0  ;;  %v385_v1 = vpop.f32.mrf.mxu1  ;;  %v1922_v11 = vld [vmem:[#allocation2 + $0x18] sm:$0xff]  }
  0xbd   : > { %v1911_v4 = vunpack.c.h.bf16 %v424_v55  ;;  %410 = vst [vmem:[#allocation2 + $0x24] sm:$0xff] %v1903_v46  ;;  %v1933_v18 = vunpack.c.h.bf16 %v1922_v11  ;;  %v1966_v41 = vunpack.c.l.bf16 %v1903_v46  ;;  %v712_v0 = vmul.f32 %v1876_v26, %v691_v62 }
  0xbe   : > { %v1984_v14 = vunpack.c.l.bf16 %v424_v55  ;;  %v2001_v55 = vunpack.c.h.bf16 %v1874_v25  ;;  %v599_v62 = vmul.f32 %v1861_v8, %v1901_v45 }
  0xbf   : > { %2585 = vst [vmem:[#allocation6_spill] sm:$0xff] %v1911_v4  ;;  %v1916_v5 = vpop.permute.xlu0 %708  ;;  %v507_v6 = vmul.f32 %v1886_v34, %v1911_v4  ;;  %v601_v27 = vmul.f32 %v1909_v2, %v1911_v4 }
  0xc1   : > { %v528_v15 = vmul.f32 %v1843_v54, %v507_v6  ;;  %v622_v39 = vmul.f32 %v1853_v60, %v601_v27 }
  0xc3   : > { %v1927_v16 = vpop.permute.xlu1 %951  ;;  %550 = vrot.lane.b32.xlu0 %v528_v15, %s1626_s12  ;;  %638 = vrot.lane.b32.xlu2 %v619_v19, %s1636_s13 }
  0xc4   : > { %v1930_v17 = vpop.permute.xlu2 %976  ;;  %v1946_v28 = vmul.f32 %v1927_v16, %v1933_v18  ;;  %v1948_v29 = vld [vmem:[#allocation2 + $0x28] sm:$0xff]   ;;  %546 = vrot.lane.b32.xlu1 %v526_v23, %s1626_s12  ;;  %v426_v36 = vld [vmem:[#allocation2 + $0x20] sm:$0xff]  ;;  %v694_v23 = vmul.f32 %v1939_v22, %v1911_v4 }
  0xc5   : > { %v1959_v37 = vunpack.c.l.bf16 %v1948_v29  ;;  %v1982_v10 = vunpack.c.l.bf16 %v426_v36 }
  0xc6   : > { %2586 = vst [vmem:[#allocation7_spill] sm:$0xff] %v1946_v28 }
  0xc7   : > { %v1954_v33 = vpop.permute.xlu0 %855  ;;  %v511_v27 = vmul.f32 %v1849_v58, %v1959_v37  ;;  %v605_v30 = vmul.f32 %v1861_v8, %v1959_v37 }
  0xc8   : > { %v1980_v6 = vmul.f32 %v1954_v33, %v1963_v40  ;;  %v1992_v19 = vmul.f32 %v1954_v33, %v1969_v42 }
  0xc9   : > { %v2024_v3 = vmul.f32 %v1870_v21, %v605_v30  ;;  %v2043_v30 = vunpack.c.h.bf16 %v1867_v13 }
  0xca   : > { %2587 = vst [vmem:[#allocation8_spill] sm:$0xff] %v1980_v6 }
  0xcb   : > { %v1972_v53 = vpop.permute.xlu1 %1045  ;;  %644 = vrot.lane.b32.xlu0 %v622_v39, %s1636_s13  ;;  %2589 = vst [vmem:[#allocation10_spill] sm:$0xff] %v1992_v19  ;;  %731 = vrot.lane.b32.xlu2 %v712_v0, %s1621_s10  ;;  %v2007_v39 = vunpack.c.h.bf16 %v426_v36  ;;  %v2015_v0 = vmul.f32 %v1855_v61, %v511_v27  ;;  %v455_v36 = vmul.f32 %v1845_v56, %v1982_v10 }
  0xcc   : > { %v1976_v1 = vpop.permute.xlu2 %1137  ;;  %636 = vrot.lane.b32.xlu1 %v618_v52, %s1636_s13  ;;  %v506_v52 = vmul.f32 %v1839_v50, %v1984_v14  ;;  %v715_v27 = vmul.f32 %v1863_v9, %v694_v23  ;;  %v2036_v28 = vmul.f32 %v1972_v53, %v2012_v51 }
  0xcd   : > { %v1988_v15 = vmul.f32 %v1976_v1, %v1966_v41  ;;  %v2046_v4 = vmul.f32 %v1851_v59, %v455_v36  ;;  %v2054_v23 = vmul.f32 %v1976_v1, %v1969_v42  ;;  %v456_v13 = vmul.f32 %v2031_v38, %v2007_v39 }
  0xce   : > { %2591 = vst [vmem:[#allocation12_spill] sm:$0xff] %v2036_v28  ;;  %v457_v36 = vmul.f32 %v1829_v47, %v1959_v37 }
  0xcf   : > { %2588 = vst [vmem:[#allocation9_spill] sm:$0xff] %v1988_v15  ;;  %v2009_v48 = vpop.permute.xlu0 %949 }
  0xd0   : > { %v2019_v25 = vsel %vm953_vm5, %v2009_v48, %v1927_v16  ;;  %v2040_v15 = vmul.f32 %v2009_v48, %v1963_v40  ;;  %2593 = vst [vmem:[#allocation14_spill] sm:$0xff] %v2046_v4  ;;  %v2065_v28 = vmul.f32 %v2009_v48, %v1969_v42  ;;  %v2076_v4 = vmul.f32 %v1851_v59, %v456_v13 }
  0xd1   : > { %v2050_v6 = vmul.f32 %v2019_v25, %v2001_v55  ;;  %2595 = vst [vmem:[#allocation16_spill] sm:$0xff] %v2054_v23  ;;  %v510_v23 = vmul.f32 %v1886_v34, %v2007_v39  ;;  %v2079_v38 = vmul.f32 %v1851_v59, %v457_v36  ;;  %v2093_v34 = vmul.f32 %v1976_v1, %v1963_v40 }
  0xd2   : > { %2592 = vst [vmem:[#allocation13_spill] sm:$0xff] %v2040_v15  ;;  %v620_v15 = vmul.f32 %v1865_v12, %v599_v62  ;;  %v2087_v12 = vmul.f32 %v1972_v53, %v1933_v18  ;;  %v690_v59 = vmul.f32 %v1859_v63, %v1879_v31 }
  0xd3   : > { %2594 = vst [vmem:[#allocation15_spill] sm:$0xff] %v2050_v6  ;;  %v2056_v19 = vpop.permute.xlu1 %785  ;;  %737 = vrot.lane.b32.xlu0 %v715_v27, %s1621_s10  ;;  %v527_v6 = vmul.f32 %v1843_v54, %v506_v52  ;;  %v2073_v27 = vmul.f32 %v2019_v25, %v2043_v30  ;;  %v600_v52 = vmul.f32 %v1847_v57, %v1984_v14 }
  0xd4   : > { %2596 = vst [vmem:[#allocation17_spill] sm:$0xff] %v2065_v28  ;;  %v2083_v28 = vmul.f32 %v1927_v16, %v2012_v51  ;;  %640 = vrot.lane.b32.xlu1 %v620_v15, %s1636_s13 }
  0xd5   : > { %2597 = vst [vmem:[#allocation18_spill] sm:$0xff] %v2073_v27  ;;  %548 = vrot.lane.b32.xlu2 %v527_v6, %s1626_s12  ;;  %v711_v27 = vmul.f32 %v1876_v26, %v690_v59  ;;  %v604_v59 = vmul.f32 %v1909_v2, %v2007_v39 }
  0xd6   : > { %2598 = vst [vmem:[#allocation19_spill] sm:$0xff] %v2076_v4 }
  0xd7   : > { %2599 = vst [vmem:[#allocation20_spill] sm:$0xff] %v2083_v28  ;;  %v1044_v62 = vpop.permute.xlu0 %1043  ;;  %v625_v2 = vmul.f32 %v1870_v21, %v604_v59 }
  0xd8   : > { %2600 = vst [vmem:[#allocation21_spill] sm:$0xff] %v2087_v12  ;;  %v2101_v13 = vsel %vm1047_vm7, %v1044_v62, %v1972_v53  ;;  %v2104_v36 = vmul.f32 %v1044_v62, %v1966_v41  ;;  %v2107_v6 = vmul.f32 %v1044_v62, %v1969_v42  ;;  %v2110_v15 = vmul.f32 %v1044_v62, %v1963_v40 }
  0xd9   : > { %2601 = vst [vmem:[#allocation22_spill] sm:$0xff] %v2093_v34  ;;  %v531_v34 = vmul.f32 %v1855_v61, %v510_v23  ;;  %v2115_v12 = vmul.f32 %v2101_v13, %v2043_v30  ;;  %v2119_v28 = vmul.f32 %v2101_v13, %v2001_v55  ;;  %v621_v23 = vmul.f32 %v1853_v60, %v600_v52 }
  0xda   : > { %2602 = vst [vmem:[#allocation23_spill] sm:$0xff] %v2110_v15  ;;  %v692_v52 = vmul.f32 %v1888_v35, %v1901_v45 }
  0xdb   : > { %2603 = vst [vmem:[#allocation24_spill] sm:$0xff] %v2119_v28  ;;  %v2122_v4 = vpop.permute.xlu1 %1139  ;;  %556 = vrot.lane.b32.xlu0 %v531_v34, %s1626_s12 }
  0xdc   : > { %v2128_v62 = vsel %vm1141_vm8, %v1976_v1, %v2122_v4  ;;  %v2133_v15 = vmul.f32 %v2122_v4, %v2012_v51  ;;  %v2137_v28 = vmul.f32 %v2122_v4, %v1933_v18  ;;  %729 = vrot.lane.b32.xlu1 %v711_v27, %s1621_s10  ;;  %v509_v27 = vmul.f32 %v1839_v50, %v1982_v10 }
  0xdd   : > { %v2143_v34 = vmul.f32 %v2128_v62, %v2043_v30  ;;  %v2147_v1 = vmul.f32 %v2128_v62, %v2001_v55  ;;  %642 = vrot.lane.b32.xlu2 %v621_v23, %s1636_s13  ;;  %v2608_v50 = vmov 0  }
  0xde   : > { %2604 = vst [vmem:[#allocation25_spill] sm:$0xff] %v2133_v15  ;;  %v2158_v15 = vunpack.c.l.bf16 %v1922_v11  ;;  %v530_v59 = vmul.f32 %v1855_v61, %v509_v27  ;;  %v696_v61 = vmul.f32 %v1859_v63, %v1982_v10 }
  0xdf   : > { %2605 = vst [vmem:[#allocation26_spill] sm:$0xff] %v2137_v28  ;;  %v693_v28 = vmul.f32 %v1859_v63, %v1984_v14  ;;  %v964_v63 = vmul.f32 %v2009_v48, %v1966_v41 }
  0xe0   : > { %2606 = vst [vmem:[#allocation27_spill] sm:$0xff] %v2143_v34  ;;  %v508_v23 = vmul.f32 %v1849_v58, %v2158_v15 }
  0xe1   : > { %2607 = vst [vmem:[#allocation28_spill] sm:$0xff] %v2147_v1  ;;  %v714_v34 = vmul.f32 %v1863_v9, %v693_v28  ;;  %v713_v1 = vmul.f32 %v1876_v26, %v692_v52  ;;  %v603_v26 = vmul.f32 %v1847_v57, %v1982_v10  ;;  %v602_v28 = vmul.f32 %v1861_v8, %v2158_v15  ;;  %v2201_v10 = vpop.permute.xlu2 %1070  ;;  %v2211_v52 = vpop.permute.xlu0 %781 }
  0xe2   : > { %v529_v11 = vmul.f32 %v1843_v54, %v508_v23  ;;  %v698_v54 = vmul.f32 %v1888_v35, %v1959_v37  ;;  %v695_v57 = vmul.f32 %v1888_v35, %v2158_v15  ;;  %v870_v37 = vmul.f32 %v1954_v33, %v1966_v41 }
  0xe3   : > { %650 = vrot.lane.b32.xlu0 %v625_v2, %s1636_s13  ;;  %v624_v58 = vmul.f32 %v1870_v21, %v603_v26  ;;  %v717_v21 = vmul.f32 %v1916_v5, %v696_v61  ;;  %v697_v2 = vmul.f32 %v1939_v22, %v2007_v39  ;;  %v2226_v23 = vunpack.c.h.bf16 %v1903_v46 }
  0xe4   : > { %733 = vrot.lane.b32.xlu1 %v713_v1, %s1621_s10  ;;  %v719_v8 = vmul.f32 %v1916_v5, %v698_v54  ;;  %v891_v35 = vmul.f32 %v1896_v43, %v870_v37  ;;  %v2609_v1 = vmov 8   ;;  %v795_v22 = vmul.f32 %v2056_v19, %v2001_v55 }
  0xe5   : > { %735 = vrot.lane.b32.xlu2 %v714_v34, %s1621_s10  ;;  %v623_v34 = vmul.f32 %v1853_v60, %v602_v28  ;;  %v716_v60 = vmul.f32 %v1863_v9, %v695_v57  ;;  %v985_v9 = vmul.f32 %v1930_v17, %v964_v63  ;;  %v718_v27 = vmul.f32 %v1916_v5, %v697_v2  ;;  %v2248_v28 = vpop.permute.xlu1 %878 }
  0xe6   : > { %v797_v5 = vmul.f32 %v2226_v23, %v1872_v24  ;;  %v2610_v39 = vmov 7   ;;  %v449_v57 = vmul.f32 %v1845_v56, %v1879_v31  ;;  %v451_v37 = vmul.f32 %v1829_v47, %v1901_v45 }
  0xe8   : > { %v475_v45 = vmul.f32 %v1835_v49, %v451_v37 }
  0xe9   : > { %v2214_v48 = vpop.permute.xlu2 %1164  ;;  %v2244_v26 = vpop.permute.xlu0 %874 }
  0xeb   : > { %1062 = vperm.xlu0 %1548, %v1764_v7  }
  0xec   : > { %552 = vrot.lane.b32.xlu1 %v529_v11, %s1626_s12 }
  0xed   : > { %554 = vrot.lane.b32.xlu2 %v530_v59, %s1626_s12 }
  0xf3   : > { %1549 = vset.pattern.permute.xlu0 %v2608_v50 }
  0xf4   : > { %465 = vperm.xlu0 %1549, %v1787_v20   ;;  %646 = vrot.lane.b32.xlu1 %v623_v34, %s1636_s13 }
  0xf5   : > { %648 = vrot.lane.b32.xlu2 %v624_v58, %s1636_s13 }
  0xfc   : > { %745 = vrot.lane.b32.xlu0 %v719_v8, %s1621_s10  ;;  %739 = vrot.lane.b32.xlu1 %v716_v60, %s1621_s10  ;;  %v796_v8 = vmul.f32 %v1966_v41, %v1872_v24  ;;  %v473_v60 = vmul.f32 %v1835_v49, %v449_v57 }
  0xfd   : > { %741 = vrot.lane.b32.xlu2 %v717_v21, %s1621_s10 }
 0x104   : > { %915 = vrot.lane.b32.xlu0 %v891_v35, %s1637_s17  ;;  %558 = vrot.lane.b32.xlu1 %v2015_v0, %s1626_s12  ;;  %v792_v0 = vmul.f32 %v2211_v52, %v1969_v42  ;;  %v851_v42 = vunpack.c.h.bf16 %v1948_v29  ;;  %v794_v35 = vmul.f32 %v2056_v19, %v1963_v40  ;;  %s1640_s12 = smov 94  }
 0x105   : > { %972 = vperm.xlu2 %1547, %v1787_v20  }
 0x106   : > { %v872_v59 = vmul.f32 %v1898_v44, %v851_v42  ;;  %v966_v34 = vmul.f32 %v1927_v16, %v851_v42 }
 0x108   : > { %v893_v29 = vmul.f32 %v1896_v43, %v872_v59  ;;  %v987_v61 = vmul.f32 %v1930_v17, %v966_v34 }
 0x10c   : > { %1009 = vrot.lane.b32.xlu0 %v985_v9, %s1638_s18  ;;  %652 = vrot.lane.b32.xlu1 %v2024_v3, %s1636_s13 }
 0x10d   : > { %1551 = vset.pattern.permute.xlu2 %v2609_v1 }
 0x10e   : > { %1156 = vperm.xlu2 %1551, %v1764_v7  }
 0x114   : > { %804 = vrot.lane.b32.xlu0 %v792_v0, %s1620_s23  ;;  %968 = vperm.xlu1 %1546, %v1764_v7   ;;  %v1060_v7 = vmul.f32 %v1972_v53, %v851_v42  ;;  %v866_v53 = vmul.f32 %v1898_v44, %v2012_v51  ;;  %v860_v51 = vsel %vm859_vm9, %v1954_v33, %v1898_v44 }
 0x115   : > { %v545_v3 = vpop.permute.xlu2 %544  ;;  %v871_v33 = vmul.f32 %v860_v51, %v2226_v23  ;;  %v865_v59 = vmul.f32 %v860_v51, %v2043_v30 }
 0x116   : > { %743 = vrot.lane.b32.xlu2 %v718_v27, %s1621_s10  ;;  %v1081_v11 = vmul.f32 %v2201_v10, %v1060_v7  ;;  %s1639_s10 = smov 95   ;;  %v887_v54 = vmul.f32 %v2244_v26, %v866_v53  ;;  %v793_v53 = vmul.f32 %v2211_v52, %v2043_v30  ;;  %v1079_v52 = vmul.f32 %v2201_v10, %v2104_v36  ;;  %v2613_v36 = vld [vmem:[#allocation10_spill] sm:$0xff] }
 0x117   : > { %1554 = vset.pattern.permute.xlu2 %v2608_v50 }
 0x11c   : > { %810 = vrot.lane.b32.xlu0 %v795_v22, %s1620_s23  ;;  %1550 = vset.pattern.permute.xlu1 %v2610_v39 }
 0x11d   : > { %1066 = vperm.xlu1 %1550, %v1787_v20   ;;  %v2238_v46 = vpop.permute.xlu2 %638 }
 0x11e   : > { %814 = vrot.lane.b32.xlu2 %v797_v5, %s1620_s23 }
 0x124   : > { %1107 = vrot.lane.b32.xlu0 %v1081_v11, %s1639_s10  ;;  %v886_v11 = vmul.f32 %v2244_v26, %v865_v59 }
 0x125   : > { %1552 = vset.pattern.permute.xlu1 %v2609_v1  ;;  %v2252_v58 = vpop.permute.xlu2 %731  ;;  %v892_v1 = vmul.f32 %v1896_v43, %v871_v33  ;;  %v965_v43 = vmul.f32 %v2019_v25, %v2226_v23 }
 0x126   : > { %919 = vrot.lane.b32.xlu2 %v893_v29, %s1637_s17  ;;  %1160 = vperm.xlu1 %1552, %v1787_v20   ;;  %v869_v20 = vmul.f32 %v1898_v44, %v1933_v18  ;;  %v2611_v44 = vld [vmem:[#allocation11_spill] sm:$0xff] }
 0x127   : > { %v450_v18 = vmul.f32 %v2611_v44, %v1881_v32 }
 0x128   : > { %v890_v24 = vmul.f32 %v2248_v28, %v869_v20  ;;  %v868_v20 = vmul.f32 %v860_v51, %v2001_v55 }
 0x129   : > { %v474_v32 = vmul.f32 %v1835_v49, %v450_v18 }
 0x12c   : > { %907 = vrot.lane.b32.xlu0 %v887_v54, %s1637_s17 }
 0x12d   : > { %v543_v21 = vpop.permute.xlu1 %542 }
 0x12e   : > { %1013 = vrot.lane.b32.xlu2 %v987_v61, %s1638_s18  ;;  %812 = vrot.lane.b32.xlu1 %v796_v8, %s1620_s23  ;;  %v561_v31 = vsel %vm560_vm4, %v543_v21, %v545_v3 }
 0x12f   : > { %v549_v16 = vpop.permute.xlu2 %548  ;;  %1553 = vset.pattern.permute.xlu1 %v2608_v50  ;;  %v576_v41 = vadd.f32 %v561_v31, %v473_v60  ;;  %v1154_v50 = vmul.f32 %v2122_v4, %v851_v42  ;;  %v1059_v4 = vmul.f32 %v2101_v13, %v2226_v23  ;;  %v986_v13 = vmul.f32 %v1930_v17, %v965_v43  ;;  %v2612_v60 = vld [vmem:[#allocation14_spill] sm:$0xff]  ;;  %v2616_v43 = vld [vmem:[#allocation9_spill] sm:$0xff] }
 0x131   : > { %v1175_v27 = vmul.f32 %v2214_v48, %v1154_v50  ;;  %v1080_v42 = vmul.f32 %v2201_v10, %v1059_v4  ;;  %v885_v10 = vmul.f32 %v2244_v26, %v2613_v36  ;;  %v452_v4 = vmul.f32 %v1845_v56, %v1984_v14 }
 0x134   : > { %913 = vrot.lane.b32.xlu0 %v890_v24, %s1637_s17 }
 0x135   : > { %v2281_v63 = vpop.permute.xlu0 %550 }
 0x136   : > { %v2286_v9 = vsel %vm560_vm4, %v549_v16, %v2281_v63  ;;  %808 = vrot.lane.b32.xlu2 %v794_v35, %s1620_s23  ;;  %917 = vrot.lane.b32.xlu1 %v892_v1, %s1637_s17  ;;  %v547_v40 = vpop.permute.xlu1 %546  ;;  %v889_v16 = vmul.f32 %v2248_v28, %v868_v20 }
 0x137   : > { %v643_v2 = vpop.permute.xlu2 %642  ;;  %v562_v19 = vsel %vm560_vm4, %v545_v3, %v547_v40  ;;  %v578_v0 = vadd.f32 %v547_v40, %v475_v45 }
 0x138   : > { %v577_v22 = vadd.f32 %v562_v19, %v474_v32  ;;  %v2614_v32 = vld [vmem:[#allocation8_spill] sm:$0xff] }
 0x139   : > { %v888_v26 = vmul.f32 %v2248_v28, %v2614_v32  ;;  %v1173_v28 = vmul.f32 %v2214_v48, %v2616_v43  ;;  %v2620_v32 = vld [vmem:[#allocation20_spill] sm:$0xff] }
 0x13c   : > { %1201 = vrot.lane.b32.xlu0 %v1175_v27, %s1640_s12  ;;  %v2615_v27 = vld [vmem:[#allocation6_spill] sm:$0xff] }
 0x13d   : > { %v2301_v49 = vpop.permute.xlu0 %644 }
 0x13e   : > { %v2305_v3 = vsel %vm654_vm10, %v643_v2, %v2301_v49  ;;  %1105 = vrot.lane.b32.xlu2 %v1080_v42, %s1639_s10  ;;  %1011 = vrot.lane.b32.xlu1 %v986_v13, %s1638_s18  ;;  %v637_v25 = vpop.permute.xlu1 %636 }
 0x13f   : > { %v736_v5 = vpop.permute.xlu2 %735  ;;  %v655_v39 = vsel %vm654_vm10, %v637_v25, %v2238_v46 }
 0x140   : > { %v670_v7 = vadd.f32 %v655_v39, %v576_v41  ;;  %v1153_v41 = vmul.f32 %v2128_v62, %v2226_v23 }
 0x142   : > { %v1174_v33 = vmul.f32 %v2214_v48, %v1153_v41 }
 0x145   : > { %v2314_v29 = vpop.permute.xlu0 %737 }
 0x146   : > { %v749_v17 = vsel %vm498_vm2, %v736_v5, %v2314_v29  ;;  %905 = vrot.lane.b32.xlu2 %v886_v11, %s1637_s17  ;;  %806 = vrot.lane.b32.xlu1 %v793_v53, %s1620_s23  ;;  %v641_v54 = vpop.permute.xlu1 %640 }
 0x147   : > { %v555_v34 = vpop.permute.xlu2 %554  ;;  %v656_v57 = vsel %vm654_vm10, %v2238_v46, %v641_v54  ;;  %v672_v61 = vadd.f32 %v641_v54, %v578_v0 }
 0x148   : > { %v671_v8 = vadd.f32 %v656_v57, %v577_v22  ;;  %v453_v22 = vmul.f32 %v2611_v44, %v2615_v27 }
 0x14d   : > { %v557_v21 = vpop.permute.xlu0 %556 }
 0x14e   : > { %v565_v30 = vsel %vm560_vm4, %v555_v34, %v557_v21  ;;  %911 = vrot.lane.b32.xlu2 %v889_v16, %s1637_s17  ;;  %1103 = vrot.lane.b32.xlu1 %v1079_v52, %s1639_s10  ;;  %v730_v46 = vpop.permute.xlu1 %729  ;;  %v2617_v52 = vld [vmem:[#allocation19_spill] sm:$0xff] }
 0x14f   : > { %v582_v31 = vadd.f32 %v565_v30, %v2612_v60  ;;  %v649_v24 = vpop.permute.xlu2 %648  ;;  %v747_v55 = vsel %vm498_vm2, %v730_v46, %v2252_v58 }
 0x150   : > { %v2336_v51 = vadd.f32 %v747_v55, %v670_v7 }
 0x155   : > { %v651_v37 = vpop.permute.xlu0 %650 }
 0x156   : > { %v659_v18 = vsel %vm654_vm10, %v649_v24, %v651_v37  ;;  %1199 = vrot.lane.b32.xlu2 %v1174_v33, %s1640_s12  ;;  %903 = vrot.lane.b32.xlu1 %v885_v10, %s1637_s17  ;;  %v734_v62 = vpop.permute.xlu1 %733 }
 0x157   : > { %v676_v35 = vadd.f32 %v659_v18, %v582_v31  ;;  %v742_v50 = vpop.permute.xlu2 %741  ;;  %v748_v23 = vsel %vm498_vm2, %v2252_v58, %v734_v62  ;;  %v2346_v1 = vadd.f32 %v734_v62, %v672_v61  ;;  %v454_v58 = vmul.f32 %v1829_v47, %v2158_v15  ;;  %v2619_v62 = vld [vmem:[#allocation18_spill] sm:$0xff] }
 0x158   : > { %v2348_v45 = vadd.f32 %v748_v23, %v671_v8 }
 0x15d   : > { %v2350_v2 = vpop.permute.xlu0 %1062 }
 0x15e   : > { %909 = vrot.lane.b32.xlu1 %v888_v26, %s1637_s17  ;;  %v553_v19 = vpop.permute.xlu1 %552 }
 0x15f   : > { %v2354_v40 = vpop.permute.xlu2 %972  ;;  %v564_v0 = vsel %vm560_vm4, %v2281_v63, %v553_v19 }
 0x166   : > { %v466_v42 = vpop.permute.xlu0 %465  ;;  %1197 = vrot.lane.b32.xlu1 %v1173_v28, %s1640_s12  ;;  %v647_v39 = vpop.permute.xlu1 %646  ;;  %v2623_v28 = vld [vmem:[#allocation13_spill] sm:$0xff] }
 0x167   : > { %v476_v13 = vmul.f32 %v466_v42, %v452_v4  ;;  %v477_v5 = vmul.f32 %v466_v42, %v453_v22  ;;  %v478_v25 = vmul.f32 %v466_v42, %v454_v58  ;;  %v658_v63 = vsel %vm654_vm10, %v2301_v49, %v647_v39  ;;  %v2621_v58 = vld [vmem:[#allocation15_spill] sm:$0xff] }
 0x168   : > { %v2371_v14 = vpop.permute.xlu2 %1156  ;;  %v2622_v4 = vld [vmem:[#allocation7_spill] sm:$0xff]  ;;  %v982_v42 = vmul.f32 %v2354_v40, %v2623_v28 }
 0x169   : > { %v579_v47 = vadd.f32 %v2286_v9, %v476_v13  ;;  %v580_v15 = vadd.f32 %v564_v0, %v477_v5  ;;  %v581_v56 = vadd.f32 %v553_v19, %v478_v25  ;;  %v984_v27 = vmul.f32 %v2354_v40, %v2622_v4 }
 0x16b   : > { %v674_v44 = vadd.f32 %v658_v63, %v580_v15  ;;  %v675_v7 = vadd.f32 %v647_v39, %v581_v56  ;;  %v673_v48 = vadd.f32 %v2305_v3, %v579_v47  ;;  %v1074_v63 = vmul.f32 %v2350_v2, %v2115_v12  ;;  %v2624_v47 = vld [vmem:[#allocation12_spill] sm:$0xff]  ;;  %v2626_v12 = vld [vmem:[#allocation21_spill] sm:$0xff] }
 0x16c   : > { %v1073_v56 = vmul.f32 %v2350_v2, %v2107_v6 }
 0x16d   : > { %v765_v59 = vadd.f32 %v749_v17, %v673_v48  ;;  %v2625_v48 = vld [vmem:[#allocation24_spill] sm:$0xff] }
 0x16e   : > { %v746_v11 = vpop.permute.xlu0 %745  ;;  %v740_v53 = vpop.permute.xlu1 %739 }
 0x16f   : > { %v750_v34 = vsel %vm498_vm2, %v2314_v29, %v740_v53  ;;  %v767_v54 = vadd.f32 %v740_v53, %v675_v7 }
 0x170   : > { %v744_v57 = vpop.permute.xlu2 %743  ;;  %v766_v61 = vadd.f32 %v750_v34, %v674_v44  ;;  %v2627_v34 = vld [vmem:[#allocation23_spill] sm:$0xff] }
 0x171   : > { %v751_v49 = vsel %vm498_vm2, %v742_v50, %v744_v57  ;;  %v752_v9 = vsel %vm498_vm2, %v744_v57, %v746_v11 }
 0x172   : > { %v768_v8 = vadd.f32 %v751_v49, %v676_v35  ;;  %v2618_v35 = vld [vmem:[#allocation17_spill] sm:$0xff] }
 0x176   : > { %v2378_v20 = vpop.permute.xlu0 %915  ;;  %v559_v16 = vpop.permute.xlu1 %558 }
 0x177   : > { %v566_v30 = vsel %vm560_vm4, %v557_v21, %v559_v16  ;;  %v584_v3 = vadd.f32 %v559_v16, %v2079_v38 }
 0x178   : > { %v815_v17 = vpop.permute.xlu2 %814  ;;  %v583_v60 = vadd.f32 %v566_v30, %v2617_v52  ;;  %v2628_v30 = vld [vmem:[#allocation16_spill] sm:$0xff]  ;;  %v2629_v52 = vld [vmem:[#allocation27_spill] sm:$0xff] }
 0x17e   : > { %v2383_v31 = vpop.permute.xlu0 %1009  ;;  %v653_v29 = vpop.permute.xlu1 %652 }
 0x17f   : > { %v660_v24 = vsel %vm654_vm10, %v651_v37, %v653_v29  ;;  %v678_v46 = vadd.f32 %v653_v29, %v584_v3  ;;  %v1167_v3 = vmul.f32 %v2371_v14, %v2628_v30 }
 0x180   : > { %v920_v41 = vpop.permute.xlu2 %919  ;;  %v677_v55 = vadd.f32 %v660_v24, %v583_v60  ;;  %v1168_v60 = vmul.f32 %v2371_v14, %v2629_v52 }
 0x181   : > { %v770_v33 = vadd.f32 %v746_v11, %v678_v46 }
 0x182   : > { %v769_v36 = vadd.f32 %v752_v9, %v677_v55 }
 0x183   : > { %v836_v10 = vadd.f32 %v815_v17, %v770_v33  ;;  %v2630_v33 = vld [vmem:[#allocation22_spill] sm:$0xff] }
 0x186   : > { %v2386_v18 = vpop.permute.xlu0 %804  ;;  %v969_v38 = vpop.permute.xlu1 %968 }
 0x187   : > { %v2390_v21 = vadd.f32 %v2386_v18, %v2336_v51  ;;  %v979_v50 = vmul.f32 %v969_v38, %v2618_v35  ;;  %v980_v23 = vmul.f32 %v969_v38, %v2619_v62  ;;  %v981_v26 = vmul.f32 %v969_v38, %v2620_v32  ;;  %v2631_v38 = vld [vmem:[#allocation28_spill] sm:$0xff] }
 0x188   : > { %v1014_v37 = vpop.permute.xlu2 %1013  ;;  %v983_v51 = vmul.f32 %v2354_v40, %v2621_v58  ;;  %v1075_v40 = vmul.f32 %v2350_v2, %v2624_v47 }
 0x189   : > { %1001 = vrot.lane.b32.xlu0 %v981_v26, %s1638_s18  ;;  %999 = vrot.lane.b32.xlu2 %v980_v23, %s1638_s18  ;;  %v1229_v26 = vld [vmem:[%s2571_s5 + $0x8] sm:$0xff] }
 0x18a   : > { %997 = vrot.lane.b32.xlu1 %v979_v50, %s1638_s18  ;;  %v2632_v50 = vld [vmem:[#allocation25_spill] sm:$0xff] }
 0x18b   : > { %v1169_v62 = vmul.f32 %v2371_v14, %v2632_v50  ;;  %v1228_v14 = vld [vmem:[%s2571_s5] sm:$0xff] }
 0x18e   : > { %v811_v19 = vpop.permute.xlu0 %810 }
 0x18f   : > { %v2398_v0 = vadd.f32 %v811_v19, %v767_v54  ;;  %v1067_v43 = vpop.permute.xlu1 %1066 }
 0x190   : > { %v809_v22 = vpop.permute.xlu2 %808  ;;  %v1078_v11 = vmul.f32 %v1067_v43, %v2626_v12  ;;  %v1076_v54 = vmul.f32 %v1067_v43, %v2627_v34 }
 0x191   : > { %v817_v13 = vsel %vm444_vm6, %v809_v22, %v811_v19  ;;  %v2407_v5 = vadd.f32 %v809_v22, %v765_v59  ;;  %1007 = vrot.lane.b32.xlu0 %v984_v27, %s1638_s18  ;;  %1005 = vrot.lane.b32.xlu2 %v983_v51, %s1638_s18  ;;  %v1077_v59 = vmul.f32 %v1067_v43, %v2625_v48  ;;  %v2633_v19 = vld [vmem:[#allocation26_spill] sm:$0xff] }
 0x192   : > { %v2409_v25 = vadd.f32 %v817_v13, %v766_v61  ;;  %1003 = vrot.lane.b32.xlu1 %v982_v42, %s1638_s18  ;;  %s296_s18 = sand.u32 1, %s1609_s28  }
 0x196   : > { %v2414_v39 = vpop.permute.xlu0 %1107 }
 0x198   : > { %v2420_v15 = vpop.permute.xlu2 %1105  ;;  %v1161_v44 = vpop.permute.xlu1 %1160 }
 0x199   : > { %1095 = vrot.lane.b32.xlu0 %v1075_v40, %s1639_s10  ;;  %1093 = vrot.lane.b32.xlu2 %v1074_v63, %s1639_s10  ;;  %v1171_v35 = vmul.f32 %v1161_v44, %v2631_v38 }
 0x19a   : > { %1091 = vrot.lane.b32.xlu1 %v1073_v56, %s1639_s10 }
 0x19e   : > { %v908_v7 = vpop.permute.xlu0 %907 }
 0x1a0   : > { %v2429_v53 = vpop.permute.xlu2 %905  ;;  %v813_v2 = vpop.permute.xlu1 %812 }
 0x1a1   : > { %v923_v6 = vsel %vm921_vm11, %v2429_v53, %v908_v7  ;;  %v818_v57 = vsel %vm444_vm6, %v813_v2, %v815_v17  ;;  %v834_v61 = vadd.f32 %v813_v2, %v768_v8  ;;  %1101 = vrot.lane.b32.xlu0 %v1078_v11, %s1639_s10  ;;  %1099 = vrot.lane.b32.xlu2 %v1077_v59, %s1639_s10  ;;  %v1230_v8 = vld [vmem:[%s2571_s5 + $0x10] sm:$0xff] }
 0x1a2   : > { %v835_v49 = vadd.f32 %v818_v57, %v769_v36  ;;  %1097 = vrot.lane.b32.xlu1 %v1076_v54, %s1639_s10  ;;  %v1170_v36 = vmul.f32 %v1161_v44, %v2630_v33  ;;  %v1115_v57 = vsel %vm1109_vm13, %v2420_v15, %v2414_v39  ;;  %s1443_s10 = sshll.u32 %s296_s18, 3 }
 0x1a3   : > { %v943_v9 = vadd.f32 %v2378_v20, %v834_v61  ;;  %s298_s21 = scalar_lea.vmem [#allocation3], %s1443_s10  ;;  %s1575_s10 = scalar_lea.hbm %s2574_s8, 16 }
 0x1a4   : > { %s1377_s22 = sshll.u32 %s298_s21, 4  ;;  %s1378_s22 = int_to_ptr.vmem [resolvable:$true] %s1377_s22 }
 0x1a5   : > { %v1037_v16 = vadd.f32 %v2383_v31, %v943_v9 }
 0x1a6   : > { %v914_v40 = vpop.permute.xlu0 %913 }
 0x1a8   : > { %v918_v17 = vpop.permute.xlu1 %917  ;;  %v912_v13 = vpop.permute.xlu2 %911 }
 0x1a9   : > { %v926_v29 = vsel %vm921_vm11, %v2378_v20, %v918_v17  ;;  %v927_v24 = vsel %vm921_vm11, %v918_v17, %v920_v41  ;;  %1187 = vrot.lane.b32.xlu0 %v1168_v60, %s1640_s12  ;;  %1185 = vrot.lane.b32.xlu2 %v1167_v3, %s1640_s12 }
 0x1aa   : > { %v944_v46 = vadd.f32 %v926_v29, %v835_v49  ;;  %v945_v55 = vadd.f32 %v927_v24, %v836_v10  ;;  %1243 = vperm.xlu1 %1553, %v1230_v8  }
 0x1b0   : > { %v1012_v23 = vpop.permute.xlu1 %1011  ;;  %v1200_v63 = vpop.permute.xlu2 %1199 }
 0x1b1   : > { %v1020_v20 = vsel %vm1015_vm12, %v2383_v31, %v1012_v23  ;;  %v1021_v41 = vsel %vm1015_vm12, %v1012_v23, %v1014_v37  ;;  %1193 = vrot.lane.b32.xlu0 %v1171_v35, %s1640_s12  ;;  %1191 = vrot.lane.b32.xlu2 %v1170_v36, %s1640_s12  ;;  %v1172_v31 = vmul.f32 %v1161_v44, %v2633_v19 }
 0x1b2   : > { %v1038_v10 = vadd.f32 %v1020_v20, %v944_v46  ;;  %v1039_v32 = vadd.f32 %v1021_v41, %v945_v55  ;;  %1189 = vrot.lane.b32.xlu1 %v1169_v62, %s1640_s12 }
 0x1b4   : > { %v1133_v49 = vadd.f32 %v1115_v57, %v1039_v32 }
 0x1b8   : > { %v807_v58 = vpop.permute.xlu1 %806 }
 0x1b9   : > { %v816_v37 = vsel %vm444_vm6, %v2386_v18, %v807_v58  ;;  %v830_v51 = vadd.f32 %v807_v58, %v2346_v1  ;;  %1238 = vperm.xlu0 %1549, %v1229_v26   ;;  %1233 = vperm.xlu2 %1554, %v1228_v14   ;;  %v1202_v1 = vpop.permute.xlu0 %1201 }
 0x1ba   : > { %v829_v4 = vadd.f32 %v816_v37, %v2348_v45  ;;  %1195 = vrot.lane.b32.xlu1 %v1172_v31, %s1640_s12  ;;  %v1209_v30 = vsel %vm1203_vm14, %v1200_v63, %v1202_v1  ;;  %s1463_s12 = sshll.u32 %s1707_s9, 3  ;;  %s1364_s9 = scalar_lea.sflag [#allocation4], %s296_s18 }
 0x1bb   : > { %v2474_v27 = vadd.f32 %v923_v6, %v830_v51  ;;  %v1227_v17 = vadd.f32 %v1209_v30, %v1133_v49  ;;  %s1375_s20 = scalar_lea.hbm %s2574_s8, %s1463_s12 }
 0x1bc   : > { %s1379_s24 = sshll.u32 %s1375_s20, 4  ;;  %s1380_s24 = int_to_ptr.hbm [resolvable:$true] %s1379_s24 }
 0x1bd   : > { %s1569_s25 = sshra.s32 %s1380_s24, 4  ;;  %s1570_s25 = int_to_ptr.hbm [resolvable:$true] %s1569_s25 }
 0x1be   : > { %s1571_s13 = scalar_lea.hbm %s1570_s25, 8  ;;  %p1576_p0 = scmp.lt.s32.totalorder %s1570_s25, %s2574_s8 }
 0x1bf   : > { %p1572_p11 = scmp.ne.s32.totalorder %s1570_s25, %s1571_s13  ;;  %p1577_p1 = scmp.lt.s32.totalorder %s1575_s10, %s1571_s13 }
 0x1c0   : > { %v1104_v22 = vpop.permute.xlu1 %1103 }
 0x1c1   : > { %v1131_v43 = vadd.f32 %v1104_v22, %v1037_v16  ;;  %v1114_v61 = vsel %vm1109_vm13, %v1104_v22, %v2420_v15  ;;  %p1573_p12 = pnand %p1572_p11, %p1724_p5  ;;  %p1578_p2 = por %p1577_p1, %p1576_p0 }
 0x1c2   : > { %v1132_v16 = vadd.f32 %v1114_v61, %v1038_v10 }
 0x1c3   : > { %p1574_p13 = pneg %p1573_p12 }
 0x1c5   : > { %p1579_p3 = pnand %p1578_p2, %p1574_p13 }
 0x1c8   : > { %v904_v28 = vpop.permute.xlu1 %903 }
 0x1c9   : > { %v937_v42 = vadd.f32 %v904_v28, %v2390_v21  ;;  %v922_v3 = vsel %vm921_vm11, %v904_v28, %v2429_v53 }
 0x1ca   : > { %v938_v24 = vadd.f32 %v922_v3, %v829_v4 }
 0x1d0   : > { %v910_v18 = vpop.permute.xlu1 %909 }
 0x1d1   : > { %v924_v53 = vsel %vm921_vm11, %v910_v18, %v912_v13  ;;  %v940_v14 = vadd.f32 %v910_v18, %v2407_v5 }
 0x1d2   : > { %v941_v28 = vadd.f32 %v924_v53, %v2409_v25  ;;  %v1280_v53 = vld [vmem:[%s2573_s7] sm:$0xf] }
 0x1d8   : > { %v1198_v44 = vpop.permute.xlu1 %1197 }
 0x1d9   : > { %v1208_v9 = vsel %vm1203_vm14, %v1198_v44, %v1200_v63  ;;  %v1225_v46 = vadd.f32 %v1198_v44, %v1131_v43  ;;  %v925_v43 = vsel %vm921_vm11, %v912_v13, %v914_v40 }
 0x1da   : > { %v1226_v60 = vadd.f32 %v1208_v9, %v1132_v16 }
 0x1e3   : > { %v1000_v47 = vpop.permute.xlu2 %999 }
 0x1eb   : > { %v2477_v56 = vpop.permute.xlu2 %1005 }
 0x1f3   : > { %v1094_v45 = vpop.permute.xlu2 %1093 }
 0x1fb   : > { %v1002_v7 = vpop.permute.xlu0 %1001  ;;  %v2479_v11 = vpop.permute.xlu2 %1099 }
 0x1fc   : > { %v998_v48 = vpop.permute.xlu1 %997  ;;  %v1017_v23 = vsel %vm1015_vm12, %v1000_v47, %v1002_v7 }
 0x1fd   : > { %v1016_v29 = vsel %vm1015_vm12, %v998_v48, %v1000_v47  ;;  %v1031_v33 = vadd.f32 %v998_v48, %v937_v42  ;;  %v1033_v42 = vadd.f32 %v1017_v23, %v2474_v27 }
 0x1fe   : > { %v1032_v38 = vadd.f32 %v1016_v29, %v938_v24 }
 0x203   : > { %v1008_v59 = vpop.permute.xlu0 %1007  ;;  %v1186_v6 = vpop.permute.xlu2 %1185 }
 0x204   : > { %v1004_v12 = vpop.permute.xlu1 %1003  ;;  %v1019_v13 = vsel %vm1015_vm12, %v2477_v56, %v1008_v59 }
 0x205   : > { %v1018_v19 = vsel %vm1015_vm12, %v1004_v12, %v2477_v56  ;;  %v1034_v63 = vadd.f32 %v1004_v12, %v940_v14 }
 0x206   : > { %v1035_v40 = vadd.f32 %v1018_v19, %v941_v28 }
 0x20b   : > { %v1096_v34 = vpop.permute.xlu0 %1095  ;;  %v1192_v52 = vpop.permute.xlu2 %1191 }
 0x20c   : > { %v1092_v54 = vpop.permute.xlu1 %1091  ;;  %v1111_v31 = vsel %vm1109_vm13, %v1094_v45, %v1096_v34  ;;  %v942_v34 = vadd.f32 %v925_v43, %v2398_v0 }
 0x20d   : > { %v1110_v36 = vsel %vm1109_vm13, %v1092_v54, %v1094_v45  ;;  %v1125_v41 = vadd.f32 %v1092_v54, %v1031_v33  ;;  %v1127_v25 = vadd.f32 %v1111_v31, %v1033_v42  ;;  %v1352_v42 = vld.sshfl [vmem:[#allocation1 + $0x8] sm:$0xff pattern:$0x75316420] }
 0x20e   : > { %v1126_v10 = vadd.f32 %v1110_v36, %v1032_v38  ;;  %v1036_v61 = vadd.f32 %v1019_v13, %v942_v34 }
 0x20f   : > { %v1219_v5 = vadd.f32 %v1186_v6, %v1125_v41 }
 0x213   : > { %v2481_v21 = vpop.permute.xlu0 %1101  ;;  %v1234_v47 = vpop.permute.xlu2 %1233 }
 0x214   : > { %v1098_v2 = vpop.permute.xlu1 %1097  ;;  %v1246_v27 = vadd.f32 %v1234_v47, %v1219_v5  ;;  %v1113_v57 = vsel %vm1109_vm13, %v2479_v11, %v2481_v21 }
 0x215   : > { %v1112_v18 = vsel %vm1109_vm13, %v1098_v2, %v2479_v11  ;;  %v1128_v7 = vadd.f32 %v1098_v2, %v1034_v63  ;;  %v1130_v30 = vadd.f32 %v1113_v57, %v1036_v61 }
 0x216   : > { %v1129_v54 = vadd.f32 %v1112_v18, %v1035_v40  ;;  %v1255_v56 = vmax.f32 %v1246_v27, 0.0 }
 0x217   : > { %v1222_v49 = vadd.f32 %v1192_v52, %v1128_v7 }
 0x218   : > { %v1264_v11 = vmin.f32 %v1255_v56, 6.0 }
 0x21b   : > { %v1188_v8 = vpop.permute.xlu0 %1187 }
 0x21c   : > { %v1244_v39 = vpop.permute.xlu1 %1243  ;;  %v1204_v20 = vsel %vm1203_vm14, %v1186_v6, %v1188_v8 }
 0x21d   : > { %v1253_v15 = vadd.f32 %v1244_v39, %v1226_v60  ;;  %v1254_v55 = vadd.f32 %v1244_v39, %v1227_v17  ;;  %v1252_v35 = vadd.f32 %v1244_v39, %v1225_v46  ;;  %v1220_v58 = vadd.f32 %v1204_v20, %v1126_v10 }
 0x21f   : > { %v1262_v50 = vmax.f32 %v1253_v15, 0.0  ;;  %v1263_v62 = vmax.f32 %v1254_v55, 0.0  ;;  %v1261_v37 = vmax.f32 %v1252_v35, 0.0  ;;  %v1247_v45 = vadd.f32 %v1234_v47, %v1220_v58 }
 0x221   : > { %v1272_v32 = vmin.f32 %v1263_v62, 6.0  ;;  %v1271_v26 = vmin.f32 %v1262_v50, 6.0  ;;  %v1270_v12 = vmin.f32 %v1261_v37, 6.0  ;;  %v1256_v59 = vmax.f32 %v1247_v45, 0.0  ;;  %v1279_v37 = vld [vmem:[%s2572_s6] sm:$0x3] }
 0x223   : > { %v1194_v51 = vpop.permute.xlu0 %1193  ;;  %v1278_v4 = vpack.c.bf16 %v1272_v32, %v1272_v32  ;;  %v1277_v22 = vpack.c.bf16 %v1271_v26, %v1271_v26  ;;  %v1276_v2 = vpack.c.bf16 %v1270_v12, %v1270_v12  ;;  %v1265_v21 = vmin.f32 %v1256_v59, 6.0 }
 0x224   : > { %v1190_v1 = vpop.permute.xlu1 %1189  ;;  %v1206_v48 = vsel %vm1203_vm14, %v1192_v52, %v1194_v51 }
 0x225   : > { %v1205_v44 = vsel %vm1203_vm14, %v1188_v8, %v1190_v1  ;;  %1302 = vrot.lane.b32.xlu2 %v1278_v4, %s1633_s26  ;;  %1300 = vrot.lane.b32.xlu1 %v1277_v22, %s1633_s26  ;;  %v1223_v9 = vadd.f32 %v1206_v48, %v1129_v54  ;;  %v1351_v1 = vld.sshfl [vmem:[#allocation1] sm:$0xff pattern:$0x75316420] }
 0x226   : > { %v1221_v6 = vadd.f32 %v1205_v44, %v1127_v25 }
 0x228   : > { %v1248_v3 = vadd.f32 %v1234_v47, %v1221_v6 }
 0x22a   : > { %v1257_v52 = vmax.f32 %v1248_v3, 0.0 }
 0x22b   : > { %v1239_v16 = vpop.permute.xlu0 %1238 }
 0x22c   : > { %v1249_v60 = vadd.f32 %v1239_v16, %v1222_v49  ;;  %v1250_v8 = vadd.f32 %v1239_v16, %v1223_v9  ;;  %v1196_v17 = vpop.permute.xlu1 %1195  ;;  %v1266_v35 = vmin.f32 %v1257_v52, 6.0 }
 0x22d   : > { %v1207_v0 = vsel %vm1203_vm14, %v1194_v51, %v1196_v17  ;;  %1298 = vrot.lane.b32.xlu1 %v1276_v2, %s1633_s26 }
 0x22e   : > { %v1258_v29 = vmax.f32 %v1249_v60, 0.0  ;;  %v1259_v39 = vmax.f32 %v1250_v8, 0.0  ;;  %v1224_v24 = vadd.f32 %v1207_v0, %v1130_v30 }
 0x230   : > { %v1267_v46 = vmin.f32 %v1258_v29, 6.0  ;;  %v1268_v15 = vmin.f32 %v1259_v39, 6.0  ;;  %v1251_v55 = vadd.f32 %v1239_v16, %v1224_v24 }
 0x232   : > { %v1260_v33 = vmax.f32 %v1251_v55, 0.0  ;;  %v1274_v36 = vpack.c.bf16 %v1268_v15, %v1265_v21  ;;  %v1273_v38 = vpack.c.bf16 %v1267_v46, %v1264_v11 }
 0x234   : > { %v1269_v50 = vmin.f32 %v1260_v33, 6.0  ;;  %1294 = vrot.lane.b32.xlu2 %v1274_v36, %s1633_s26 }
 0x235   : > { %1292 = vrot.lane.b32.xlu1 %v1273_v38, %s1633_s26 }
 0x236   : > { %v1275_v62 = vpack.c.bf16 %v1269_v50, %v1266_v35 }
 0x238   : > { %1296 = vrot.lane.b32.xlu0 %v1275_v62, %s1633_s26 }
 0x23c   : > { %1283 = vperm.xlu2 %1554, %v1280_v53  }
 0x27f   : > { %v1303_v23 = vpop.permute.xlu2 %1302 }
 0x28e   : > { %v1295_v19 = vpop.permute.xlu2 %1294 }
 0x296   : > { %v1284_v43 = vpop.permute.xlu2 %1283 }
 0x297   : > { %v1301_v20 = vpop.permute.xlu1 %1300 }
 0x298   : > { %v1308_v41 = vsel %vm1141_vm8, %v1301_v20, %v1303_v23 }
 0x299   : > { %v1320_v10 = vsel %vm1315_vm15, %v1308_v41, 0 }
 0x29a   : > { %1341 = vmatpush.bf16.msra.mxu3 %v1320_v10 }
 0x29f   : > { %v1299_v32 = vpop.permute.xlu1 %1298 }
 0x2a0   : > { %v1307_v26 = vsel %vm1141_vm8, %v1299_v32, %v1301_v20 }
 0x2a1   : > { %v1317_v14 = vsel %vm1315_vm15, %v1307_v26, 0 }
 0x2a2   : > { %1328 = vmatpush.bf16.msra.mxu2 %v1317_v14 }
 0x2a7   : > { %v1293_v31 = vpop.permute.xlu1 %1292 }
 0x2a8   : > { %v1305_v58 = vsel %vm1141_vm8, %v1293_v31, %v1295_v19 }
 0x2a9   : > { %1329 = vmatpush.bf16.msra.mxu2 %v1305_v58 }
 0x2aa   : > { %v1297_v51 = vpop.permute.xlu0 %1296 }
 0x2ab   : > { %v1306_v4 = vsel %vm1141_vm8, %v1295_v19, %v1297_v51 }
 0x2ac   : > { %1454 = vmatmul.msk.bf16.vlgmr.msra.gmra.mxu2 %vm1311_vm0, %v1279_v37  ;;  %1342 = vmatpush.bf16.msra.mxu3 %v1306_v4 }
 0x2af   : > { %1455 = vmatmul.msk.bf16.vlgmr.msra.gmra.mxu3 %vm1311_vm0, %v1279_v37 }
 0x32f   : > { %v1331_v22 = vpop.f32.mrf.mxu2 }
 0x330   : > { %v1332_v63 = vadd.f32 %v1331_v22, %v1284_v43 }
 0x332   : > { %v1344_v28 = vpop.f32.mrf.mxu3  ;;  %v1355_v18 = vadd.f32 %v1351_v1, %v1332_v63 }
 0x333   : > { %v1345_v47 = vadd.f32 %v1344_v28, %v1284_v43 }
 0x335   : > { %v1356_v5 = vadd.f32 %v1352_v42, %v1345_v47 }
 0x337   : > { %v1359_v44 = vrot.slane %v1356_v5, 4  ;;  %v1333_v13 = vpop.f32.mrf.mxu2 }
 0x339   : > { %v1360_v40 = vsel %vm1315_vm15, %v1355_v18, %v1359_v44 }
 0x33a   : > { %v1346_v25 = vpop.f32.mrf.mxu3  ;;  %1362 = vst [vmem:[%s298_s21] sm:$0xff] %v1360_v40 }
 0x33b   : > { %1582 = shalt.err (!%p1579_p3)
}
 0x33c   : > { %1464 = dma.vmem_to_hbm [thread:$0]  (%p1724_p5), %s1378_s22, 128, %s1380_s24, %s1364_s9  }
 0x33d PF: > { %p1470_p4 = scmp.ge.s32.totalorder %s1617_s30, 2  ;;  %s1391_s18 = sand.u32 1, %s1605_s27  }
 0x33e   : > { %s1392_s19 = scalar_lea.sflag [#allocation4], %s1391_s18 }
 0x33f   : > { %p1467_p7 = pnand %p1470_p4, %p1728_p6 }
 0x341   : > { %p1468_p8 = pneg %p1467_p7 }
 0x343   : > { %1600 = dma.done.wait (%p1468_p8), %s1392_s19, 128  }
 0x344   : > { %1602 = vsyncadd (%p1468_p8), %s1392_s19, 4294967168  ;;  %p18_p9 = scmp.ge.s32.totalorder %s1711_s11, 4   ;;  %s2634_s27 = smov %s1609_s28 }
 0x345   : > { %s2635_s28 = smov %s1613_s29  ;;  %s2636_s29 = smov %s1722_s14 }
 0x346   : > { %s2637_s30 = smov %s1711_s11  ;;  %20 = sbr.rel (!%p18_p9) target bundleno = 3 (0x3), region = 87 }
 0x34b   :  { %1398 = vsyncpa [#allocation4], 1 }
 0x34c   :  { %1400 = vsyncpa [#allocation4 + $0x1], 1 }

</bundles_post_ra>
